<compile_context>
chip_gen: v6e
topology: v6e:2x2x1
jax: 0.10.0
libtpu: 0.0.40
codegen_flags: <defaults>
</compile_context>

<pallas_src>
from math import ceil

import jax
import jax.numpy as jnp
from jax.experimental import pallas as pl
from jax.experimental.pallas import tpu as pltpu

_BF16 = jnp.bfloat16


# ---------------------------------------------------------------------------
# In-kernel math helpers (bf16 MXU operands, f32 accumulation)
# ---------------------------------------------------------------------------

def _bdot(a, b):
    """2-D matmul with bf16 operands and f32 accumulation."""
    return jnp.dot(a.astype(_BF16), b.astype(_BF16),
                   preferred_element_type=jnp.float32)


def _tdot(a, b):
    """a^T @ b (contract the leading/node axis), bf16 operands, f32 accumulation."""
    dn = (((0,), (0,)), ((), ()))
    return jax.lax.dot_general(a.astype(_BF16), b.astype(_BF16), dn,
                               preferred_element_type=jnp.float32)


# ---------------------------------------------------------------------------
# Fused kernel factory
# ---------------------------------------------------------------------------

def _make_fused_kernel(Bc, N, fin, hidden, n_extra, num_classes, offs,
                       cluster_sizes):
    """Fused DiffPool forward for a chunk of Bc graphs (one grid step).

    Ref layout: lengths (SMEM scalar prefetch), x (Bc,N,fin) f32,
    adj (Bc,N,N) bf16, packed weight slab (rows, width) f32,
    output (1,Bc,num_classes) f32.
    """
    del fin, num_classes  # shapes are implied by the refs

    def kernel(lengths_ref, x_ref, adj_ref, w_ref, out_ref):
        base = pl.program_id(0) * Bc          # global batch offset of this chunk

        def getw(name):
            off, r, c = offs[name]
            return w_ref[off:off + r, :c]     # static, 8-row-aligned slice

        # ------- helpers over the "stacked nodes + per-graph adjacency" layout ---
        def norm_adjs(adj_list):
            """Degree-normalize each adjacency ONCE per level and cast to bf16 so
            every aggregation matmul reuses it (no repeated broadcasts)."""
            out = []
            for a in adj_list:
                inv_deg = pl.reciprocal(
                    jnp.maximum(jnp.sum(a, axis=-1, keepdims=True), 1.0),
                    approx=True)
                out.append((a * inv_deg).astype(_BF16))
            return out

        def aggregate(adjn_list, h, n):
            """(adj_norm @ h) per graph, re-stacked to (Bc*n, f)."""
            return jnp.concatenate(
                [_bdot(adjn_list[b], h[b * n:(b + 1) * n, :]) for b in range(Bc)],
                axis=0)

        def sage_block(h, adjn_list, msk, prefix, n, f_hidden):
            """Block: x1=relu(SAGE1(h)), x2=relu(SAGE2(x1)), lin(cat([x1,x2])).
            Shared-weight matmuls run on the stacked (Bc*n, f) view."""
            h1 = (_bdot(aggregate(adjn_list, h, n), getw(prefix + 'w1_rel'))
                  + _bdot(h, getw(prefix + 'w1_root')) + getw(prefix + 'b1'))
            if msk is not None:
                h1 = h1 * msk
            h1 = jnp.maximum(h1, 0.0)
            h2 = (_bdot(aggregate(adjn_list, h1, n), getw(prefix + 'w2_rel'))
                  + _bdot(h1, getw(prefix + 'w2_root')) + getw(prefix + 'b2'))
            if msk is not None:
                h2 = h2 * msk
            h2 = jnp.maximum(h2, 0.0)
            wl = getw(prefix + 'w_lin')
            # JumpingKnowledge('cat') + Linear == sum of two half matmuls
            return (_bdot(h1, wl[:f_hidden, :]) + _bdot(h2, wl[f_hidden:, :])
                    + getw(prefix + 'b_lin'))

        def graph_means(h, n):
            """Per-graph mean over the (padded) node axis -> (Bc, f)."""
            return jnp.concatenate(
                [jnp.sum(h[b * n:(b + 1) * n, :], axis=0, keepdims=True)
                 for b in range(Bc)], axis=0) * (1.0 / n)

        def diff_pool(h, adj_list, s, msk, n):
            """dense_diff_pool (link/entropy losses are discarded by the reference)."""
            m = jnp.max(s, axis=-1, keepdims=True)
            e = jnp.exp(s - m)
            s = e / jnp.sum(e, axis=-1, keepdims=True)   # exact divide (parity)
            if msk is not None:
                h = h * msk
                s = s * msk
            hp, ap = [], []
            for b in range(Bc):
                sb = s[b * n:(b + 1) * n, :]
                hb = h[b * n:(b + 1) * n, :]
                hp.append(_tdot(sb, hb))                 # s^T x       -> (C, H)
                u = _bdot(adj_list[b], sb)               # adj @ s     -> (n, C)
                ap.append(_tdot(sb, u))                  # s^T adj s   -> (C, C)
            return jnp.concatenate(hp, axis=0), ap

        # ------- node-validity mask from scalar-prefetched graph sizes ----------
        row_iota = jax.lax.broadcasted_iota(jnp.int32, (N, 1), 0)
        mask = jnp.concatenate(
            [(row_iota < lengths_ref[base + b]).astype(jnp.float32)
             for b in range(Bc)], axis=0)                # (Bc*N, 1)

        # ------- level 1 (masked) ------------------------------------------------
        x = jnp.concatenate([x_ref[b] for b in range(Bc)], axis=0)   # (Bc*N, fin)
        adjs = [adj_ref[b].astype(jnp.float32) for b in range(Bc)]   # bf16 -> f32
        adjn = norm_adjs(adjs)

        s = sage_block(x, adjn, mask, 'pool1_', N, hidden)
        xe = jnp.maximum(sage_block(x, adjn, mask, 'embed1_', N, hidden), 0.0)
        xs = [graph_means(xe, N)]
        xp, adjps = diff_pool(xe, adjs, s, mask, N)

        # ------- deeper levels (unmasked, matching the reference) ----------------
        for i in range(n_extra):
            cn = cluster_sizes[i]                        # node count at this level
            adjn_p = norm_adjs(adjps)
            if i < n_extra - 1:                          # last pool block is dead code
                s = sage_block(xp, adjn_p, None, 'pool%d_' % (i + 2), cn, hidden)
            xe = jnp.maximum(
                sage_block(xp, adjn_p, None, 'embed%d_' % (i + 2), cn, hidden), 0.0)
            xs.append(graph_means(xe, cn))
            if i < n_extra - 1:
                xp, adjps = diff_pool(xe, adjps, s, None, cn)

        # ------- head: JK('cat') + lin1 + relu + (dropout=id) + lin2 + log_softmax
        lin1_w = getw('lin1_w')
        h = getw('lin1_b')
        for li, xv in enumerate(xs):                     # cat @ lin1 == sum of chunks
            h = h + _bdot(xv, lin1_w[li * hidden:(li + 1) * hidden, :])
        h = jnp.maximum(h, 0.0)
        logits = _bdot(h, getw('lin2_w')) + getw('lin2_b')
        m = jnp.max(logits, axis=-1, keepdims=True)
        lse = jnp.log(jnp.sum(jnp.exp(logits - m), axis=-1, keepdims=True)) + m
        out_ref[0] = logits - lse

    return kernel


# ---------------------------------------------------------------------------
# Wrapper: parameter packing + pallas_call
# ---------------------------------------------------------------------------

def _pack_params(params, n_extra):
    """Pack every used weight/bias into ONE row-stacked f32 slab (fewer operands,
    one DMA).  Each tensor starts at an 8-row-aligned offset so all in-kernel
    slices are sublane-aligned."""
    entries = []

    def add_block(prefix, p):
        for k in ('w1_rel', 'w1_root', 'b1', 'w2_rel', 'w2_root', 'b2',
                  'w_lin', 'b_lin'):
            entries.append((prefix + k, p[k]))

    add_block('pool1_', params['pool_block1'])
    add_block('embed1_', params['embed_block1'])
    for i in range(n_extra):
        if i < n_extra - 1:                     # last pool block output is unused
            add_block('pool%d_' % (i + 2), params['pool_blocks'][i])
        add_block('embed%d_' % (i + 2), params['embed_blocks'][i])
    entries += [('lin1_w', params['lin1_w']), ('lin1_b', params['lin1_b']),
                ('lin2_w', params['lin2_w']), ('lin2_b', params['lin2_b'])]

    mats = [jnp.asarray(a, jnp.float32).reshape(1, -1) if a.ndim == 1
            else jnp.asarray(a, jnp.float32) for _, a in entries]
    width = max(int(a.shape[1]) for a in mats)

    offs, rows, cur = {}, [], 0
    for (name, _), a in zip(entries, mats):
        r, c = a.shape
        offs[name] = (cur, r, c)
        rpad = (-r) % 8
        rows.append(jnp.pad(a, ((0, rpad), (0, width - c))))
        cur += r + rpad
    return jnp.concatenate(rows, axis=0), offs


def diffpool_forward(params, x, adj, lengths, *, core_split=1):
    """Fused DiffPool forward.

    core_split > 1 keeps a core_split-step grid with CORE_PARALLEL batch sharding
    (for v7x's two TensorCores); the default single step is right for v5e/v6e.
    """
    B, N, fin = x.shape
    hidden = params['embed_block1']['w1_rel'].shape[1]
    n_extra = len(params['embed_blocks'])
    num_classes = params['lin2_w'].shape[1]
    cluster_sizes = ([params['pool_block1']['w_lin'].shape[1]]
                     + [p['w_lin'].shape[1] for p in params['pool_blocks']])

    if core_split < 1 or B % core_split != 0:
        core_split = 1
    Bc = B // core_split

    slab, offs = _pack_params(params, n_extra)
    kernel = _make_fused_kernel(Bc=Bc, N=N, fin=fin, hidden=hidden,
                                n_extra=n_extra, num_classes=num_classes,
                                offs=offs, cluster_sizes=cluster_sizes)

    grid_spec = pltpu.PrefetchScalarGridSpec(
        num_scalar_prefetch=1,
        grid=(core_split,),
        in_specs=[
            pl.BlockSpec((Bc, N, fin), lambda i, lens: (i, 0, 0)),
            pl.BlockSpec((Bc, N, N), lambda i, lens: (i, 0, 0)),
            pl.BlockSpec(slab.shape, lambda i, lens: (0, 0)),
        ],
        out_specs=pl.BlockSpec((1, Bc, num_classes), lambda i, lens: (i, 0, 0)),
    )

    # TODO(synk): gate core_split=2 (CORE_PARALLEL) on v7x generation detection.
    semantics = (pltpu.CORE_PARALLEL,) if core_split > 1 else ("arbitrary",)

    out = pl.pallas_call(
        kernel,
        out_shape=jax.ShapeDtypeStruct((core_split, Bc, num_classes), jnp.float32),
        grid_spec=grid_spec,
        compiler_params=pltpu.CompilerParams(
            dimension_semantics=semantics,
            vmem_limit_bytes=32 * 1024 * 1024),   # headroom on v5e (16 MiB default)
    )(lengths.astype(jnp.int32),
      x.astype(jnp.float32),
      adj.astype(jnp.bfloat16),   # 0/1 adjacency: bf16 is exact, halves HBM bytes
      slab)
    return out.reshape(B, num_classes)


# ---------------------------------------------------------------------------
# Parameter initialization (deterministic, mimics torch Linear init)
# ---------------------------------------------------------------------------

def init_linear(key, fin, fout):
    k1, k2 = jax.random.split(key)
    bound = 1.0 / jnp.sqrt(jnp.float32(fin))
    w = jax.random.uniform(k1, (fin, fout), jnp.float32, -bound, bound)
    b = jax.random.uniform(k2, (fout,), jnp.float32, -bound, bound)
    return w, b


def init_block(key, fin, hidden, fout):
    ks = jax.random.split(key, 5)
    w1r, _ = init_linear(ks[0], fin, hidden)          # conv1.lin_rel (no bias)
    w1o, b1 = init_linear(ks[1], fin, hidden)         # conv1.lin_root
    w2r, _ = init_linear(ks[2], hidden, fout)         # conv2.lin_rel (no bias)
    w2o, b2 = init_linear(ks[3], hidden, fout)        # conv2.lin_root
    wl, bl = init_linear(ks[4], hidden + fout, fout)  # Block.lin
    return dict(w1_rel=w1r, w1_root=w1o, b1=b1,
                w2_rel=w2r, w2_root=w2o, b2=b2,
                w_lin=wl, b_lin=bl)


def make_diffpool_params(key, num_features, num_classes, num_nodes,
                         num_layers=4, hidden=32, ratio=0.25):
    keys = iter(jax.random.split(key, 32))
    params = {}
    nn = ceil(ratio * num_nodes)
    params['embed_block1'] = init_block(next(keys), num_features, hidden, hidden)
    params['pool_block1'] = init_block(next(keys), num_features, hidden, nn)
    params['embed_blocks'] = []
    params['pool_blocks'] = []
    for _ in range(num_layers // 2 - 1):
        nn = ceil(ratio * nn)
        params['embed_blocks'].append(init_block(next(keys), hidden, hidden, hidden))
        params['pool_blocks'].append(init_block(next(keys), hidden, hidden, nn))
    params['lin1_w'], params['lin1_b'] = init_linear(
        next(keys), (len(params['embed_blocks']) + 1) * hidden, hidden)
    params['lin2_w'], params['lin2_b'] = init_linear(next(keys), hidden, num_classes)
    return params


# ---------------------------------------------------------------------------
# Main
# ---------------------------------------------------------------------------

if __name__ == "__main__":
    B, N, F_IN, HIDDEN, NUM_CLASSES, NUM_LAYERS, RATIO = 2, 16, 8, 32, 4, 4, 0.25

    key = jax.random.PRNGKey(0)
    kp, kx, ka = jax.random.split(key, 3)

    params = make_diffpool_params(kp, F_IN, NUM_CLASSES, N,
                                  num_layers=NUM_LAYERS, hidden=HIDDEN, ratio=RATIO)

    x = jax.random.normal(kx, (B, N, F_IN), jnp.float32)
    a = jax.random.uniform(ka, (B, N, N))
    adj = (a < 0.4).astype(jnp.float32)
    adj = jnp.maximum(adj, jnp.transpose(adj, (0, 2, 1)))    # symmetric 0/1

    lengths = jnp.array([16, 12], dtype=jnp.int32)           # valid nodes per graph
    mf = (jnp.arange(N)[None, :] < lengths[:, None]).astype(jnp.float32)
    adj = adj * mf[:, :, None] * mf[:, None, :]              # zero edges to padded nodes

    fwd = jax.jit(lambda x_, adj_, l_: diffpool_forward(params, x_, adj_, l_))
    out = jax.block_until_ready(fwd(x, adj, lengths))

    assert out.shape == (B, NUM_CLASSES)
    assert bool(jnp.all(jnp.isfinite(out)))
    # rows of log_softmax must sum (in prob space) to ~1
    assert bool(jnp.allclose(jnp.sum(jnp.exp(out), axis=-1), 1.0, atol=1e-4))
    print("KERNEL_OK")
</pallas_src>

<mosaic_0001>
module attributes {stable_mosaic.version = 11 : i64} {
  func.func @kernel(%arg0: i32, %arg1: memref<2xi32, #tpu.memory_space<smem>>, %arg2: memref<2x16x8xf32, #tpu.memory_space<vmem>>, %arg3: memref<2x16x16xbf16, #tpu.memory_space<vmem>>, %arg4: memref<640x32xf32, #tpu.memory_space<vmem>>, %arg5: memref<1x2x4xf32, #tpu.memory_space<vmem>>) attributes {dimension_semantics = [#tpu.dimension_semantics<arbitrary>], iteration_bounds = array<i64: 1>, scalar_prefetch = 1 : i64, scratch_operands = 0 : i64, tpu.core_type = #tpu.core_type<tc>, window_params = [{transform_indices = @transform_0, window_bounds = array<i64: 2, 16, 8>}, {transform_indices = @transform_1, window_bounds = array<i64: 2, 16, 16>}, {pipeline_mode = #tpu.pipeline_mode<synchronous>, transform_indices = @transform_2, window_bounds = array<i64: 640, 32>}, {transform_indices = @transform_3, window_bounds = array<i64: 1, 2, 4>}]} {
    %c2_i32 = arith.constant 2 : i32
    %0 = arith.muli %arg0, %c2_i32 : i32
    %1 = tpu.iota {dimensions = array<i32: 0>} : vector<16x1xi32>
    %c0_i32 = arith.constant 0 : i32
    %2 = arith.addi %0, %c0_i32 : i32
    %3 = arith.index_cast %2 : i32 to index
    %4 = memref.load %arg1[%3] : memref<2xi32, #tpu.memory_space<smem>>
    %5 = vector.broadcast %4 : i32 to vector<16x1xi32>
    %6 = arith.cmpi slt, %1, %5 : vector<16x1xi32>
    %7 = arith.extui %6 : vector<16x1xi1> to vector<16x1xi32>
    %8 = arith.sitofp %7 : vector<16x1xi32> to vector<16x1xf32>
    %c1_i32 = arith.constant 1 : i32
    %9 = arith.addi %0, %c1_i32 : i32
    %10 = arith.index_cast %9 : i32 to index
    %11 = memref.load %arg1[%10] : memref<2xi32, #tpu.memory_space<smem>>
    %12 = vector.broadcast %11 : i32 to vector<16x1xi32>
    %13 = arith.cmpi slt, %1, %12 : vector<16x1xi32>
    %14 = arith.extui %13 : vector<16x1xi1> to vector<16x1xi32>
    %15 = arith.sitofp %14 : vector<16x1xi32> to vector<16x1xf32>
    %16 = tpu.concatenate %8, %15 in 0 : vector<16x1xf32>, vector<16x1xf32> -> vector<32x1xf32>
    %c0 = arith.constant 0 : index
    %c0_0 = arith.constant 0 : index
    %c0_1 = arith.constant 0 : index
    %17 = vector.load %arg2[%c0, %c0_0, %c0_1] : memref<2x16x8xf32, #tpu.memory_space<vmem>>, vector<1x16x8xf32>
    %18 = vector.shape_cast %17 : vector<1x16x8xf32> to vector<16x8xf32>
    %c1 = arith.constant 1 : index
    %c0_2 = arith.constant 0 : index
    %c0_3 = arith.constant 0 : index
    %19 = vector.load %arg2[%c1, %c0_2, %c0_3] : memref<2x16x8xf32, #tpu.memory_space<vmem>>, vector<1x16x8xf32>
    %20 = vector.shape_cast %19 : vector<1x16x8xf32> to vector<16x8xf32>
    %21 = tpu.concatenate %18, %20 in 0 : vector<16x8xf32>, vector<16x8xf32> -> vector<32x8xf32>
    %c0_4 = arith.constant 0 : index
    %c0_5 = arith.constant 0 : index
    %c0_6 = arith.constant 0 : index
    %22 = vector.load %arg3[%c0_4, %c0_5, %c0_6] : memref<2x16x16xbf16, #tpu.memory_space<vmem>>, vector<1x16x16xbf16>
    %23 = vector.shape_cast %22 : vector<1x16x16xbf16> to vector<16x16xbf16>
    %24 = arith.extf %23 : vector<16x16xbf16> to vector<16x16xf32>
    %c1_7 = arith.constant 1 : index
    %c0_8 = arith.constant 0 : index
    %c0_9 = arith.constant 0 : index
    %25 = vector.load %arg3[%c1_7, %c0_8, %c0_9] : memref<2x16x16xbf16, #tpu.memory_space<vmem>>, vector<1x16x16xbf16>
    %26 = vector.shape_cast %25 : vector<1x16x16xbf16> to vector<16x16xbf16>
    %27 = arith.extf %26 : vector<16x16xbf16> to vector<16x16xf32>
    %cst = arith.constant dense<0.000000e+00> : vector<16xf32>
    %28 = vector.multi_reduction <add>, %24, %cst [1] : vector<16x16xf32> to vector<16xf32>
    %29 = vector.shape_cast %28 : vector<16xf32> to vector<16x1xf32>
    %cst_10 = arith.constant 1.000000e+00 : f32
    %30 = vector.broadcast %cst_10 : f32 to vector<16x1xf32>
    %31 = arith.maximumf %29, %30 : vector<16x1xf32>
    %32 = tpu.reciprocal %31 {approx = true} : vector<16x1xf32> -> vector<16x1xf32>
    %33 = vector.broadcast %32 : vector<16x1xf32> to vector<16x16xf32>
    %34 = arith.mulf %24, %33 : vector<16x16xf32>
    %35 = arith.truncf %34 : vector<16x16xf32> to vector<16x16xbf16>
    %cst_11 = arith.constant dense<0.000000e+00> : vector<16xf32>
    %36 = vector.multi_reduction <add>, %27, %cst_11 [1] : vector<16x16xf32> to vector<16xf32>
    %37 = vector.shape_cast %36 : vector<16xf32> to vector<16x1xf32>
    %cst_12 = arith.constant 1.000000e+00 : f32
    %38 = vector.broadcast %cst_12 : f32 to vector<16x1xf32>
    %39 = arith.maximumf %37, %38 : vector<16x1xf32>
    %40 = tpu.reciprocal %39 {approx = true} : vector<16x1xf32> -> vector<16x1xf32>
    %41 = vector.broadcast %40 : vector<16x1xf32> to vector<16x16xf32>
    %42 = arith.mulf %27, %41 : vector<16x16xf32>
    %43 = arith.truncf %42 : vector<16x16xf32> to vector<16x16xbf16>
    %44 = vector.extract_strided_slice %21 {offsets = [0, 0], sizes = [16, 8], strides = [1, 1]} : vector<32x8xf32> to vector<16x8xf32>
    %45 = arith.truncf %44 : vector<16x8xf32> to vector<16x8xbf16>
    %cst_13 = arith.constant dense<0.000000e+00> : vector<16x8xf32>
    %46 = tpu.matmul %35, %45, %cst_13 {dimension_numbers = #tpu.dot_dimension_numbers<[1], [0], [0], [1], [0, 0, 1, 1], [], []>} : vector<16x16xbf16>, vector<16x8xbf16>, vector<16x8xf32> -> vector<16x8xf32>
    %47 = vector.extract_strided_slice %21 {offsets = [16, 0], sizes = [16, 8], strides = [1, 1]} : vector<32x8xf32> to vector<16x8xf32>
    %48 = arith.truncf %47 : vector<16x8xf32> to vector<16x8xbf16>
    %cst_14 = arith.constant dense<0.000000e+00> : vector<16x8xf32>
    %49 = tpu.matmul %43, %48, %cst_14 {dimension_numbers = #tpu.dot_dimension_numbers<[1], [0], [0], [1], [0, 0, 1, 1], [], []>} : vector<16x16xbf16>, vector<16x8xbf16>, vector<16x8xf32> -> vector<16x8xf32>
    %50 = tpu.concatenate %46, %49 in 0 : vector<16x8xf32>, vector<16x8xf32> -> vector<32x8xf32>
    %c0_15 = arith.constant 0 : index
    %c0_16 = arith.constant 0 : index
    %51 = vector.load %arg4[%c0_15, %c0_16] : memref<640x32xf32, #tpu.memory_space<vmem>>, vector<8x32xf32>
    %52 = arith.truncf %50 : vector<32x8xf32> to vector<32x8xbf16>
    %53 = arith.truncf %51 : vector<8x32xf32> to vector<8x32xbf16>
    %cst_17 = arith.constant dense<0.000000e+00> : vector<32x32xf32>
    %54 = tpu.matmul %52, %53, %cst_17 {dimension_numbers = #tpu.dot_dimension_numbers<[1], [0], [0], [1], [0, 0, 1, 1], [], []>} : vector<32x8xbf16>, vector<8x32xbf16>, vector<32x32xf32> -> vector<32x32xf32>
    %c8 = arith.constant 8 : index
    %c0_18 = arith.constant 0 : index
    %55 = vector.load %arg4[%c8, %c0_18] : memref<640x32xf32, #tpu.memory_space<vmem>>, vector<8x32xf32>
    %56 = arith.truncf %21 : vector<32x8xf32> to vector<32x8xbf16>
    %57 = arith.truncf %55 : vector<8x32xf32> to vector<8x32xbf16>
    %cst_19 = arith.constant dense<0.000000e+00> : vector<32x32xf32>
    %58 = tpu.matmul %56, %57, %cst_19 {dimension_numbers = #tpu.dot_dimension_numbers<[1], [0], [0], [1], [0, 0, 1, 1], [], []>} : vector<32x8xbf16>, vector<8x32xbf16>, vector<32x32xf32> -> vector<32x32xf32>
    %59 = arith.addf %54, %58 : vector<32x32xf32>
    %c16 = arith.constant 16 : index
    %c0_20 = arith.constant 0 : index
    %60 = vector.load %arg4[%c16, %c0_20] : memref<640x32xf32, #tpu.memory_space<vmem>>, vector<1x32xf32>
    %61 = vector.broadcast %60 : vector<1x32xf32> to vector<32x32xf32>
    %62 = arith.addf %59, %61 : vector<32x32xf32>
    %63 = vector.broadcast %16 : vector<32x1xf32> to vector<32x32xf32>
    %64 = arith.mulf %62, %63 : vector<32x32xf32>
    %cst_21 = arith.constant 0.000000e+00 : f32
    %65 = vector.broadcast %cst_21 : f32 to vector<32x32xf32>
    %66 = arith.maximumf %64, %65 : vector<32x32xf32>
    %67 = vector.extract_strided_slice %66 {offsets = [0, 0], sizes = [16, 32], strides = [1, 1]} : vector<32x32xf32> to vector<16x32xf32>
    %68 = arith.truncf %67 : vector<16x32xf32> to vector<16x32xbf16>
    %cst_22 = arith.constant dense<0.000000e+00> : vector<16x32xf32>
    %69 = tpu.matmul %35, %68, %cst_22 {dimension_numbers = #tpu.dot_dimension_numbers<[1], [0], [0], [1], [0, 0, 1, 1], [], []>} : vector<16x16xbf16>, vector<16x32xbf16>, vector<16x32xf32> -> vector<16x32xf32>
    %70 = vector.extract_strided_slice %66 {offsets = [16, 0], sizes = [16, 32], strides = [1, 1]} : vector<32x32xf32> to vector<16x32xf32>
    %71 = arith.truncf %70 : vector<16x32xf32> to vector<16x32xbf16>
    %cst_23 = arith.constant dense<0.000000e+00> : vector<16x32xf32>
    %72 = tpu.matmul %43, %71, %cst_23 {dimension_numbers = #tpu.dot_dimension_numbers<[1], [0], [0], [1], [0, 0, 1, 1], [], []>} : vector<16x16xbf16>, vector<16x32xbf16>, vector<16x32xf32> -> vector<16x32xf32>
    %73 = tpu.concatenate %69, %72 in 0 : vector<16x32xf32>, vector<16x32xf32> -> vector<32x32xf32>
    %c24 = arith.constant 24 : index
    %c0_24 = arith.constant 0 : index
    %74 = vector.load %arg4[%c24, %c0_24] : memref<640x32xf32, #tpu.memory_space<vmem>>, vector<32x4xf32>
    %75 = arith.truncf %73 : vector<32x32xf32> to vector<32x32xbf16>
    %76 = arith.truncf %74 : vector<32x4xf32> to vector<32x4xbf16>
    %cst_25 = arith.constant dense<0.000000e+00> : vector<32x4xf32>
    %77 = tpu.matmul %75, %76, %cst_25 {dimension_numbers = #tpu.dot_dimension_numbers<[1], [0], [0], [1], [0, 0, 1, 1], [], []>} : vector<32x32xbf16>, vector<32x4xbf16>, vector<32x4xf32> -> vector<32x4xf32>
    %c56 = arith.constant 56 : index
    %c0_26 = arith.constant 0 : index
    %78 = vector.load %arg4[%c56, %c0_26] : memref<640x32xf32, #tpu.memory_space<vmem>>, vector<32x4xf32>
    %79 = arith.truncf %66 : vector<32x32xf32> to vector<32x32xbf16>
    %80 = arith.truncf %78 : vector<32x4xf32> to vector<32x4xbf16>
    %cst_27 = arith.constant dense<0.000000e+00> : vector<32x4xf32>
    %81 = tpu.matmul %79, %80, %cst_27 {dimension_numbers = #tpu.dot_dimension_numbers<[1], [0], [0], [1], [0, 0, 1, 1], [], []>} : vector<32x32xbf16>, vector<32x4xbf16>, vector<32x4xf32> -> vector<32x4xf32>
    %82 = arith.addf %77, %81 : vector<32x4xf32>
    %c88 = arith.constant 88 : index
    %c0_28 = arith.constant 0 : index
    %83 = vector.load %arg4[%c88, %c0_28] : memref<640x32xf32, #tpu.memory_space<vmem>>, vector<1x4xf32>
    %84 = vector.broadcast %83 : vector<1x4xf32> to vector<32x4xf32>
    %85 = arith.addf %82, %84 : vector<32x4xf32>
    %86 = vector.broadcast %16 : vector<32x1xf32> to vector<32x4xf32>
    %87 = arith.mulf %85, %86 : vector<32x4xf32>
    %cst_29 = arith.constant 0.000000e+00 : f32
    %88 = vector.broadcast %cst_29 : f32 to vector<32x4xf32>
    %89 = arith.maximumf %87, %88 : vector<32x4xf32>
    %c96 = arith.constant 96 : index
    %c0_30 = arith.constant 0 : index
    %90 = vector.load %arg4[%c96, %c0_30] : memref<640x32xf32, #tpu.memory_space<vmem>>, vector<36x4xf32>
    %91 = vector.extract_strided_slice %90 {offsets = [0, 0], sizes = [32, 4], strides = [1, 1]} : vector<36x4xf32> to vector<32x4xf32>
    %92 = arith.truncf %66 : vector<32x32xf32> to vector<32x32xbf16>
    %93 = arith.truncf %91 : vector<32x4xf32> to vector<32x4xbf16>
    %cst_31 = arith.constant dense<0.000000e+00> : vector<32x4xf32>
    %94 = tpu.matmul %92, %93, %cst_31 {dimension_numbers = #tpu.dot_dimension_numbers<[1], [0], [0], [1], [0, 0, 1, 1], [], []>} : vector<32x32xbf16>, vector<32x4xbf16>, vector<32x4xf32> -> vector<32x4xf32>
    %95 = vector.extract_strided_slice %90 {offsets = [32, 0], sizes = [4, 4], strides = [1, 1]} : vector<36x4xf32> to vector<4x4xf32>
    %96 = arith.truncf %89 : vector<32x4xf32> to vector<32x4xbf16>
    %97 = arith.truncf %95 : vector<4x4xf32> to vector<4x4xbf16>
    %cst_32 = arith.constant dense<0.000000e+00> : vector<32x4xf32>
    %98 = tpu.matmul %96, %97, %cst_32 {dimension_numbers = #tpu.dot_dimension_numbers<[1], [0], [0], [1], [0, 0, 1, 1], [], []>} : vector<32x4xbf16>, vector<4x4xbf16>, vector<32x4xf32> -> vector<32x4xf32>
    %99 = arith.addf %94, %98 : vector<32x4xf32>
    %c136 = arith.constant 136 : index
    %c0_33 = arith.constant 0 : index
    %100 = vector.load %arg4[%c136, %c0_33] : memref<640x32xf32, #tpu.memory_space<vmem>>, vector<1x4xf32>
    %101 = vector.broadcast %100 : vector<1x4xf32> to vector<32x4xf32>
    %102 = arith.addf %99, %101 : vector<32x4xf32>
    %103 = vector.extract_strided_slice %21 {offsets = [0, 0], sizes = [16, 8], strides = [1, 1]} : vector<32x8xf32> to vector<16x8xf32>
    %104 = arith.truncf %103 : vector<16x8xf32> to vector<16x8xbf16>
    %cst_34 = arith.constant dense<0.000000e+00> : vector<16x8xf32>
    %105 = tpu.matmul %35, %104, %cst_34 {dimension_numbers = #tpu.dot_dimension_numbers<[1], [0], [0], [1], [0, 0, 1, 1], [], []>} : vector<16x16xbf16>, vector<16x8xbf16>, vector<16x8xf32> -> vector<16x8xf32>
    %106 = vector.extract_strided_slice %21 {offsets = [16, 0], sizes = [16, 8], strides = [1, 1]} : vector<32x8xf32> to vector<16x8xf32>
    %107 = arith.truncf %106 : vector<16x8xf32> to vector<16x8xbf16>
    %cst_35 = arith.constant dense<0.000000e+00> : vector<16x8xf32>
    %108 = tpu.matmul %43, %107, %cst_35 {dimension_numbers = #tpu.dot_dimension_numbers<[1], [0], [0], [1], [0, 0, 1, 1], [], []>} : vector<16x16xbf16>, vector<16x8xbf16>, vector<16x8xf32> -> vector<16x8xf32>
    %109 = tpu.concatenate %105, %108 in 0 : vector<16x8xf32>, vector<16x8xf32> -> vector<32x8xf32>
    %c144 = arith.constant 144 : index
    %c0_36 = arith.constant 0 : index
    %110 = vector.load %arg4[%c144, %c0_36] : memref<640x32xf32, #tpu.memory_space<vmem>>, vector<8x32xf32>
    %111 = arith.truncf %109 : vector<32x8xf32> to vector<32x8xbf16>
    %112 = arith.truncf %110 : vector<8x32xf32> to vector<8x32xbf16>
    %cst_37 = arith.constant dense<0.000000e+00> : vector<32x32xf32>
    %113 = tpu.matmul %111, %112, %cst_37 {dimension_numbers = #tpu.dot_dimension_numbers<[1], [0], [0], [1], [0, 0, 1, 1], [], []>} : vector<32x8xbf16>, vector<8x32xbf16>, vector<32x32xf32> -> vector<32x32xf32>
    %c152 = arith.constant 152 : index
    %c0_38 = arith.constant 0 : index
    %114 = vector.load %arg4[%c152, %c0_38] : memref<640x32xf32, #tpu.memory_space<vmem>>, vector<8x32xf32>
    %115 = arith.truncf %21 : vector<32x8xf32> to vector<32x8xbf16>
    %116 = arith.truncf %114 : vector<8x32xf32> to vector<8x32xbf16>
    %cst_39 = arith.constant dense<0.000000e+00> : vector<32x32xf32>
    %117 = tpu.matmul %115, %116, %cst_39 {dimension_numbers = #tpu.dot_dimension_numbers<[1], [0], [0], [1], [0, 0, 1, 1], [], []>} : vector<32x8xbf16>, vector<8x32xbf16>, vector<32x32xf32> -> vector<32x32xf32>
    %118 = arith.addf %113, %117 : vector<32x32xf32>
    %c160 = arith.constant 160 : index
    %c0_40 = arith.constant 0 : index
    %119 = vector.load %arg4[%c160, %c0_40] : memref<640x32xf32, #tpu.memory_space<vmem>>, vector<1x32xf32>
    %120 = vector.broadcast %119 : vector<1x32xf32> to vector<32x32xf32>
    %121 = arith.addf %118, %120 : vector<32x32xf32>
    %122 = vector.broadcast %16 : vector<32x1xf32> to vector<32x32xf32>
    %123 = arith.mulf %121, %122 : vector<32x32xf32>
    %cst_41 = arith.constant 0.000000e+00 : f32
    %124 = vector.broadcast %cst_41 : f32 to vector<32x32xf32>
    %125 = arith.maximumf %123, %124 : vector<32x32xf32>
    %126 = vector.extract_strided_slice %125 {offsets = [0, 0], sizes = [16, 32], strides = [1, 1]} : vector<32x32xf32> to vector<16x32xf32>
    %127 = arith.truncf %126 : vector<16x32xf32> to vector<16x32xbf16>
    %cst_42 = arith.constant dense<0.000000e+00> : vector<16x32xf32>
    %128 = tpu.matmul %35, %127, %cst_42 {dimension_numbers = #tpu.dot_dimension_numbers<[1], [0], [0], [1], [0, 0, 1, 1], [], []>} : vector<16x16xbf16>, vector<16x32xbf16>, vector<16x32xf32> -> vector<16x32xf32>
    %129 = vector.extract_strided_slice %125 {offsets = [16, 0], sizes = [16, 32], strides = [1, 1]} : vector<32x32xf32> to vector<16x32xf32>
    %130 = arith.truncf %129 : vector<16x32xf32> to vector<16x32xbf16>
    %cst_43 = arith.constant dense<0.000000e+00> : vector<16x32xf32>
    %131 = tpu.matmul %43, %130, %cst_43 {dimension_numbers = #tpu.dot_dimension_numbers<[1], [0], [0], [1], [0, 0, 1, 1], [], []>} : vector<16x16xbf16>, vector<16x32xbf16>, vector<16x32xf32> -> vector<16x32xf32>
    %132 = tpu.concatenate %128, %131 in 0 : vector<16x32xf32>, vector<16x32xf32> -> vector<32x32xf32>
    %c168 = arith.constant 168 : index
    %c0_44 = arith.constant 0 : index
    %133 = vector.load %arg4[%c168, %c0_44] : memref<640x32xf32, #tpu.memory_space<vmem>>, vector<32x32xf32>
    %134 = arith.truncf %132 : vector<32x32xf32> to vector<32x32xbf16>
    %135 = arith.truncf %133 : vector<32x32xf32> to vector<32x32xbf16>
    %cst_45 = arith.constant dense<0.000000e+00> : vector<32x32xf32>
    %136 = tpu.matmul %134, %135, %cst_45 {dimension_numbers = #tpu.dot_dimension_numbers<[1], [0], [0], [1], [0, 0, 1, 1], [], []>} : vector<32x32xbf16>, vector<32x32xbf16>, vector<32x32xf32> -> vector<32x32xf32>
    %c200 = arith.constant 200 : index
    %c0_46 = arith.constant 0 : index
    %137 = vector.load %arg4[%c200, %c0_46] : memref<640x32xf32, #tpu.memory_space<vmem>>, vector<32x32xf32>
    %138 = arith.truncf %125 : vector<32x32xf32> to vector<32x32xbf16>
    %139 = arith.truncf %137 : vector<32x32xf32> to vector<32x32xbf16>
    %cst_47 = arith.constant dense<0.000000e+00> : vector<32x32xf32>
    %140 = tpu.matmul %138, %139, %cst_47 {dimension_numbers = #tpu.dot_dimension_numbers<[1], [0], [0], [1], [0, 0, 1, 1], [], []>} : vector<32x32xbf16>, vector<32x32xbf16>, vector<32x32xf32> -> vector<32x32xf32>
    %141 = arith.addf %136, %140 : vector<32x32xf32>
    %c232 = arith.constant 232 : index
    %c0_48 = arith.constant 0 : index
    %142 = vector.load %arg4[%c232, %c0_48] : memref<640x32xf32, #tpu.memory_space<vmem>>, vector<1x32xf32>
    %143 = vector.broadcast %142 : vector<1x32xf32> to vector<32x32xf32>
    %144 = arith.addf %141, %143 : vector<32x32xf32>
    %145 = vector.broadcast %16 : vector<32x1xf32> to vector<32x32xf32>
    %146 = arith.mulf %144, %145 : vector<32x32xf32>
    %cst_49 = arith.constant 0.000000e+00 : f32
    %147 = vector.broadcast %cst_49 : f32 to vector<32x32xf32>
    %148 = arith.maximumf %146, %147 : vector<32x32xf32>
    %c240 = arith.constant 240 : index
    %c0_50 = arith.constant 0 : index
    %149 = vector.load %arg4[%c240, %c0_50] : memref<640x32xf32, #tpu.memory_space<vmem>>, vector<64x32xf32>
    %150 = vector.extract_strided_slice %149 {offsets = [0, 0], sizes = [32, 32], strides = [1, 1]} : vector<64x32xf32> to vector<32x32xf32>
    %151 = arith.truncf %125 : vector<32x32xf32> to vector<32x32xbf16>
    %152 = arith.truncf %150 : vector<32x32xf32> to vector<32x32xbf16>
    %cst_51 = arith.constant dense<0.000000e+00> : vector<32x32xf32>
    %153 = tpu.matmul %151, %152, %cst_51 {dimension_numbers = #tpu.dot_dimension_numbers<[1], [0], [0], [1], [0, 0, 1, 1], [], []>} : vector<32x32xbf16>, vector<32x32xbf16>, vector<32x32xf32> -> vector<32x32xf32>
    %154 = vector.extract_strided_slice %149 {offsets = [32, 0], sizes = [32, 32], strides = [1, 1]} : vector<64x32xf32> to vector<32x32xf32>
    %155 = arith.truncf %148 : vector<32x32xf32> to vector<32x32xbf16>
    %156 = arith.truncf %154 : vector<32x32xf32> to vector<32x32xbf16>
    %cst_52 = arith.constant dense<0.000000e+00> : vector<32x32xf32>
    %157 = tpu.matmul %155, %156, %cst_52 {dimension_numbers = #tpu.dot_dimension_numbers<[1], [0], [0], [1], [0, 0, 1, 1], [], []>} : vector<32x32xbf16>, vector<32x32xbf16>, vector<32x32xf32> -> vector<32x32xf32>
    %158 = arith.addf %153, %157 : vector<32x32xf32>
    %c304 = arith.constant 304 : index
    %c0_53 = arith.constant 0 : index
    %159 = vector.load %arg4[%c304, %c0_53] : memref<640x32xf32, #tpu.memory_space<vmem>>, vector<1x32xf32>
    %160 = vector.broadcast %159 : vector<1x32xf32> to vector<32x32xf32>
    %161 = arith.addf %158, %160 : vector<32x32xf32>
    %cst_54 = arith.constant 0.000000e+00 : f32
    %162 = vector.broadcast %cst_54 : f32 to vector<32x32xf32>
    %163 = arith.maximumf %161, %162 : vector<32x32xf32>
    %164 = vector.extract_strided_slice %163 {offsets = [0, 0], sizes = [16, 32], strides = [1, 1]} : vector<32x32xf32> to vector<16x32xf32>
    %cst_55 = arith.constant dense<0.000000e+00> : vector<32xf32>
    %165 = vector.multi_reduction <add>, %164, %cst_55 [0] : vector<16x32xf32> to vector<32xf32>
    %166 = vector.shape_cast %165 : vector<32xf32> to vector<1x32xf32>
    %167 = vector.extract_strided_slice %163 {offsets = [16, 0], sizes = [16, 32], strides = [1, 1]} : vector<32x32xf32> to vector<16x32xf32>
    %cst_56 = arith.constant dense<0.000000e+00> : vector<32xf32>
    %168 = vector.multi_reduction <add>, %167, %cst_56 [0] : vector<16x32xf32> to vector<32xf32>
    %169 = vector.shape_cast %168 : vector<32xf32> to vector<1x32xf32>
    %170 = tpu.concatenate %166, %169 in 0 : vector<1x32xf32>, vector<1x32xf32> -> vector<2x32xf32>
    %cst_57 = arith.constant 6.250000e-02 : f32
    %171 = vector.broadcast %cst_57 : f32 to vector<2x32xf32>
    %172 = arith.mulf %170, %171 : vector<2x32xf32>
    %cst_58 = arith.constant dense<0xFF800000> : vector<32xf32>
    %173 = vector.multi_reduction <maximumf>, %102, %cst_58 [1] : vector<32x4xf32> to vector<32xf32>
    %174 = vector.shape_cast %173 : vector<32xf32> to vector<32x1xf32>
    %175 = vector.broadcast %174 : vector<32x1xf32> to vector<32x4xf32>
    %176 = arith.subf %102, %175 : vector<32x4xf32>
    %177 = math.exp %176 : vector<32x4xf32>
    %cst_59 = arith.constant dense<0.000000e+00> : vector<32xf32>
    %178 = vector.multi_reduction <add>, %177, %cst_59 [1] : vector<32x4xf32> to vector<32xf32>
    %179 = vector.shape_cast %178 : vector<32xf32> to vector<32x1xf32>
    %180 = vector.broadcast %179 : vector<32x1xf32> to vector<32x4xf32>
    %181 = arith.divf %177, %180 : vector<32x4xf32>
    %182 = vector.broadcast %16 : vector<32x1xf32> to vector<32x32xf32>
    %183 = arith.mulf %163, %182 : vector<32x32xf32>
    %184 = vector.broadcast %16 : vector<32x1xf32> to vector<32x4xf32>
    %185 = arith.mulf %181, %184 : vector<32x4xf32>
    %186 = vector.extract_strided_slice %185 {offsets = [0, 0], sizes = [16, 4], strides = [1, 1]} : vector<32x4xf32> to vector<16x4xf32>
    %187 = vector.extract_strided_slice %183 {offsets = [0, 0], sizes = [16, 32], strides = [1, 1]} : vector<32x32xf32> to vector<16x32xf32>
    %188 = arith.truncf %186 : vector<16x4xf32> to vector<16x4xbf16>
    %189 = arith.truncf %187 : vector<16x32xf32> to vector<16x32xbf16>
    %cst_60 = arith.constant dense<0.000000e+00> : vector<4x32xf32>
    %190 = tpu.matmul %188, %189, %cst_60 {dimension_numbers = #tpu.dot_dimension_numbers<[0], [0], [1], [1], [0, 1, 1, 1], [], []>} : vector<16x4xbf16>, vector<16x32xbf16>, vector<4x32xf32> -> vector<4x32xf32>
    %191 = arith.truncf %24 : vector<16x16xf32> to vector<16x16xbf16>
    %192 = arith.truncf %186 : vector<16x4xf32> to vector<16x4xbf16>
    %cst_61 = arith.constant dense<0.000000e+00> : vector<16x4xf32>
    %193 = tpu.matmul %191, %192, %cst_61 {dimension_numbers = #tpu.dot_dimension_numbers<[1], [0], [0], [1], [0, 0, 1, 1], [], []>} : vector<16x16xbf16>, vector<16x4xbf16>, vector<16x4xf32> -> vector<16x4xf32>
    %194 = arith.truncf %186 : vector<16x4xf32> to vector<16x4xbf16>
    %195 = arith.truncf %193 : vector<16x4xf32> to vector<16x4xbf16>
    %cst_62 = arith.constant dense<0.000000e+00> : vector<4x4xf32>
    %196 = tpu.matmul %194, %195, %cst_62 {dimension_numbers = #tpu.dot_dimension_numbers<[0], [0], [1], [1], [0, 1, 1, 1], [], []>} : vector<16x4xbf16>, vector<16x4xbf16>, vector<4x4xf32> -> vector<4x4xf32>
    %197 = vector.extract_strided_slice %185 {offsets = [16, 0], sizes = [16, 4], strides = [1, 1]} : vector<32x4xf32> to vector<16x4xf32>
    %198 = vector.extract_strided_slice %183 {offsets = [16, 0], sizes = [16, 32], strides = [1, 1]} : vector<32x32xf32> to vector<16x32xf32>
    %199 = arith.truncf %197 : vector<16x4xf32> to vector<16x4xbf16>
    %200 = arith.truncf %198 : vector<16x32xf32> to vector<16x32xbf16>
    %cst_63 = arith.constant dense<0.000000e+00> : vector<4x32xf32>
    %201 = tpu.matmul %199, %200, %cst_63 {dimension_numbers = #tpu.dot_dimension_numbers<[0], [0], [1], [1], [0, 1, 1, 1], [], []>} : vector<16x4xbf16>, vector<16x32xbf16>, vector<4x32xf32> -> vector<4x32xf32>
    %202 = arith.truncf %27 : vector<16x16xf32> to vector<16x16xbf16>
    %203 = arith.truncf %197 : vector<16x4xf32> to vector<16x4xbf16>
    %cst_64 = arith.constant dense<0.000000e+00> : vector<16x4xf32>
    %204 = tpu.matmul %202, %203, %cst_64 {dimension_numbers = #tpu.dot_dimension_numbers<[1], [0], [0], [1], [0, 0, 1, 1], [], []>} : vector<16x16xbf16>, vector<16x4xbf16>, vector<16x4xf32> -> vector<16x4xf32>
    %205 = arith.truncf %197 : vector<16x4xf32> to vector<16x4xbf16>
    %206 = arith.truncf %204 : vector<16x4xf32> to vector<16x4xbf16>
    %cst_65 = arith.constant dense<0.000000e+00> : vector<4x4xf32>
    %207 = tpu.matmul %205, %206, %cst_65 {dimension_numbers = #tpu.dot_dimension_numbers<[0], [0], [1], [1], [0, 1, 1, 1], [], []>} : vector<16x4xbf16>, vector<16x4xbf16>, vector<4x4xf32> -> vector<4x4xf32>
    %208 = tpu.concatenate %190, %201 in 0 : vector<4x32xf32>, vector<4x32xf32> -> vector<8x32xf32>
    %cst_66 = arith.constant dense<0.000000e+00> : vector<4xf32>
    %209 = vector.multi_reduction <add>, %196, %cst_66 [1] : vector<4x4xf32> to vector<4xf32>
    %210 = vector.shape_cast %209 : vector<4xf32> to vector<4x1xf32>
    %cst_67 = arith.constant 1.000000e+00 : f32
    %211 = vector.broadcast %cst_67 : f32 to vector<4x1xf32>
    %212 = arith.maximumf %210, %211 : vector<4x1xf32>
    %213 = tpu.reciprocal %212 {approx = true} : vector<4x1xf32> -> vector<4x1xf32>
    %214 = vector.broadcast %213 : vector<4x1xf32> to vector<4x4xf32>
    %215 = arith.mulf %196, %214 : vector<4x4xf32>
    %216 = arith.truncf %215 : vector<4x4xf32> to vector<4x4xbf16>
    %cst_68 = arith.constant dense<0.000000e+00> : vector<4xf32>
    %217 = vector.multi_reduction <add>, %207, %cst_68 [1] : vector<4x4xf32> to vector<4xf32>
    %218 = vector.shape_cast %217 : vector<4xf32> to vector<4x1xf32>
    %cst_69 = arith.constant 1.000000e+00 : f32
    %219 = vector.broadcast %cst_69 : f32 to vector<4x1xf32>
    %220 = arith.maximumf %218, %219 : vector<4x1xf32>
    %221 = tpu.reciprocal %220 {approx = true} : vector<4x1xf32> -> vector<4x1xf32>
    %222 = vector.broadcast %221 : vector<4x1xf32> to vector<4x4xf32>
    %223 = arith.mulf %207, %222 : vector<4x4xf32>
    %224 = arith.truncf %223 : vector<4x4xf32> to vector<4x4xbf16>
    %225 = vector.extract_strided_slice %208 {offsets = [0, 0], sizes = [4, 32], strides = [1, 1]} : vector<8x32xf32> to vector<4x32xf32>
    %226 = arith.truncf %225 : vector<4x32xf32> to vector<4x32xbf16>
    %cst_70 = arith.constant dense<0.000000e+00> : vector<4x32xf32>
    %227 = tpu.matmul %216, %226, %cst_70 {dimension_numbers = #tpu.dot_dimension_numbers<[1], [0], [0], [1], [0, 0, 1, 1], [], []>} : vector<4x4xbf16>, vector<4x32xbf16>, vector<4x32xf32> -> vector<4x32xf32>
    %228 = vector.extract_strided_slice %208 {offsets = [4, 0], sizes = [4, 32], strides = [1, 1]} : vector<8x32xf32> to vector<4x32xf32>
    %229 = arith.truncf %228 : vector<4x32xf32> to vector<4x32xbf16>
    %cst_71 = arith.constant dense<0.000000e+00> : vector<4x32xf32>
    %230 = tpu.matmul %224, %229, %cst_71 {dimension_numbers = #tpu.dot_dimension_numbers<[1], [0], [0], [1], [0, 0, 1, 1], [], []>} : vector<4x4xbf16>, vector<4x32xbf16>, vector<4x32xf32> -> vector<4x32xf32>
    %231 = tpu.concatenate %227, %230 in 0 : vector<4x32xf32>, vector<4x32xf32> -> vector<8x32xf32>
    %c312 = arith.constant 312 : index
    %c0_72 = arith.constant 0 : index
    %232 = vector.load %arg4[%c312, %c0_72] : memref<640x32xf32, #tpu.memory_space<vmem>>, vector<32x32xf32>
    %233 = arith.truncf %231 : vector<8x32xf32> to vector<8x32xbf16>
    %234 = arith.truncf %232 : vector<32x32xf32> to vector<32x32xbf16>
    %cst_73 = arith.constant dense<0.000000e+00> : vector<8x32xf32>
    %235 = tpu.matmul %233, %234, %cst_73 {dimension_numbers = #tpu.dot_dimension_numbers<[1], [0], [0], [1], [0, 0, 1, 1], [], []>} : vector<8x32xbf16>, vector<32x32xbf16>, vector<8x32xf32> -> vector<8x32xf32>
    %c344 = arith.constant 344 : index
    %c0_74 = arith.constant 0 : index
    %236 = vector.load %arg4[%c344, %c0_74] : memref<640x32xf32, #tpu.memory_space<vmem>>, vector<32x32xf32>
    %237 = arith.truncf %208 : vector<8x32xf32> to vector<8x32xbf16>
    %238 = arith.truncf %236 : vector<32x32xf32> to vector<32x32xbf16>
    %cst_75 = arith.constant dense<0.000000e+00> : vector<8x32xf32>
    %239 = tpu.matmul %237, %238, %cst_75 {dimension_numbers = #tpu.dot_dimension_numbers<[1], [0], [0], [1], [0, 0, 1, 1], [], []>} : vector<8x32xbf16>, vector<32x32xbf16>, vector<8x32xf32> -> vector<8x32xf32>
    %240 = arith.addf %235, %239 : vector<8x32xf32>
    %c376 = arith.constant 376 : index
    %c0_76 = arith.constant 0 : index
    %241 = vector.load %arg4[%c376, %c0_76] : memref<640x32xf32, #tpu.memory_space<vmem>>, vector<1x32xf32>
    %242 = vector.broadcast %241 : vector<1x32xf32> to vector<8x32xf32>
    %243 = arith.addf %240, %242 : vector<8x32xf32>
    %cst_77 = arith.constant 0.000000e+00 : f32
    %244 = vector.broadcast %cst_77 : f32 to vector<8x32xf32>
    %245 = arith.maximumf %243, %244 : vector<8x32xf32>
    %246 = vector.extract_strided_slice %245 {offsets = [0, 0], sizes = [4, 32], strides = [1, 1]} : vector<8x32xf32> to vector<4x32xf32>
    %247 = arith.truncf %246 : vector<4x32xf32> to vector<4x32xbf16>
    %cst_78 = arith.constant dense<0.000000e+00> : vector<4x32xf32>
    %248 = tpu.matmul %216, %247, %cst_78 {dimension_numbers = #tpu.dot_dimension_numbers<[1], [0], [0], [1], [0, 0, 1, 1], [], []>} : vector<4x4xbf16>, vector<4x32xbf16>, vector<4x32xf32> -> vector<4x32xf32>
    %249 = vector.extract_strided_slice %245 {offsets = [4, 0], sizes = [4, 32], strides = [1, 1]} : vector<8x32xf32> to vector<4x32xf32>
    %250 = arith.truncf %249 : vector<4x32xf32> to vector<4x32xbf16>
    %cst_79 = arith.constant dense<0.000000e+00> : vector<4x32xf32>
    %251 = tpu.matmul %224, %250, %cst_79 {dimension_numbers = #tpu.dot_dimension_numbers<[1], [0], [0], [1], [0, 0, 1, 1], [], []>} : vector<4x4xbf16>, vector<4x32xbf16>, vector<4x32xf32> -> vector<4x32xf32>
    %252 = tpu.concatenate %248, %251 in 0 : vector<4x32xf32>, vector<4x32xf32> -> vector<8x32xf32>
    %c384 = arith.constant 384 : index
    %c0_80 = arith.constant 0 : index
    %253 = vector.load %arg4[%c384, %c0_80] : memref<640x32xf32, #tpu.memory_space<vmem>>, vector<32x32xf32>
    %254 = arith.truncf %252 : vector<8x32xf32> to vector<8x32xbf16>
    %255 = arith.truncf %253 : vector<32x32xf32> to vector<32x32xbf16>
    %cst_81 = arith.constant dense<0.000000e+00> : vector<8x32xf32>
    %256 = tpu.matmul %254, %255, %cst_81 {dimension_numbers = #tpu.dot_dimension_numbers<[1], [0], [0], [1], [0, 0, 1, 1], [], []>} : vector<8x32xbf16>, vector<32x32xbf16>, vector<8x32xf32> -> vector<8x32xf32>
    %c416 = arith.constant 416 : index
    %c0_82 = arith.constant 0 : index
    %257 = vector.load %arg4[%c416, %c0_82] : memref<640x32xf32, #tpu.memory_space<vmem>>, vector<32x32xf32>
    %258 = arith.truncf %245 : vector<8x32xf32> to vector<8x32xbf16>
    %259 = arith.truncf %257 : vector<32x32xf32> to vector<32x32xbf16>
    %cst_83 = arith.constant dense<0.000000e+00> : vector<8x32xf32>
    %260 = tpu.matmul %258, %259, %cst_83 {dimension_numbers = #tpu.dot_dimension_numbers<[1], [0], [0], [1], [0, 0, 1, 1], [], []>} : vector<8x32xbf16>, vector<32x32xbf16>, vector<8x32xf32> -> vector<8x32xf32>
    %261 = arith.addf %256, %260 : vector<8x32xf32>
    %c448 = arith.constant 448 : index
    %c0_84 = arith.constant 0 : index
    %262 = vector.load %arg4[%c448, %c0_84] : memref<640x32xf32, #tpu.memory_space<vmem>>, vector<1x32xf32>
    %263 = vector.broadcast %262 : vector<1x32xf32> to vector<8x32xf32>
    %264 = arith.addf %261, %263 : vector<8x32xf32>
    %cst_85 = arith.constant 0.000000e+00 : f32
    %265 = vector.broadcast %cst_85 : f32 to vector<8x32xf32>
    %266 = arith.maximumf %264, %265 : vector<8x32xf32>
    %c456 = arith.constant 456 : index
    %c0_86 = arith.constant 0 : index
    %267 = vector.load %arg4[%c456, %c0_86] : memref<640x32xf32, #tpu.memory_space<vmem>>, vector<64x32xf32>
    %268 = vector.extract_strided_slice %267 {offsets = [0, 0], sizes = [32, 32], strides = [1, 1]} : vector<64x32xf32> to vector<32x32xf32>
    %269 = arith.truncf %245 : vector<8x32xf32> to vector<8x32xbf16>
    %270 = arith.truncf %268 : vector<32x32xf32> to vector<32x32xbf16>
    %cst_87 = arith.constant dense<0.000000e+00> : vector<8x32xf32>
    %271 = tpu.matmul %269, %270, %cst_87 {dimension_numbers = #tpu.dot_dimension_numbers<[1], [0], [0], [1], [0, 0, 1, 1], [], []>} : vector<8x32xbf16>, vector<32x32xbf16>, vector<8x32xf32> -> vector<8x32xf32>
    %272 = vector.extract_strided_slice %267 {offsets = [32, 0], sizes = [32, 32], strides = [1, 1]} : vector<64x32xf32> to vector<32x32xf32>
    %273 = arith.truncf %266 : vector<8x32xf32> to vector<8x32xbf16>
    %274 = arith.truncf %272 : vector<32x32xf32> to vector<32x32xbf16>
    %cst_88 = arith.constant dense<0.000000e+00> : vector<8x32xf32>
    %275 = tpu.matmul %273, %274, %cst_88 {dimension_numbers = #tpu.dot_dimension_numbers<[1], [0], [0], [1], [0, 0, 1, 1], [], []>} : vector<8x32xbf16>, vector<32x32xbf16>, vector<8x32xf32> -> vector<8x32xf32>
    %276 = arith.addf %271, %275 : vector<8x32xf32>
    %c520 = arith.constant 520 : index
    %c0_89 = arith.constant 0 : index
    %277 = vector.load %arg4[%c520, %c0_89] : memref<640x32xf32, #tpu.memory_space<vmem>>, vector<1x32xf32>
    %278 = vector.broadcast %277 : vector<1x32xf32> to vector<8x32xf32>
    %279 = arith.addf %276, %278 : vector<8x32xf32>
    %cst_90 = arith.constant 0.000000e+00 : f32
    %280 = vector.broadcast %cst_90 : f32 to vector<8x32xf32>
    %281 = arith.maximumf %279, %280 : vector<8x32xf32>
    %282 = vector.extract_strided_slice %281 {offsets = [0, 0], sizes = [4, 32], strides = [1, 1]} : vector<8x32xf32> to vector<4x32xf32>
    %cst_91 = arith.constant dense<0.000000e+00> : vector<32xf32>
    %283 = vector.multi_reduction <add>, %282, %cst_91 [0] : vector<4x32xf32> to vector<32xf32>
    %284 = vector.shape_cast %283 : vector<32xf32> to vector<1x32xf32>
    %285 = vector.extract_strided_slice %281 {offsets = [4, 0], sizes = [4, 32], strides = [1, 1]} : vector<8x32xf32> to vector<4x32xf32>
    %cst_92 = arith.constant dense<0.000000e+00> : vector<32xf32>
    %286 = vector.multi_reduction <add>, %285, %cst_92 [0] : vector<4x32xf32> to vector<32xf32>
    %287 = vector.shape_cast %286 : vector<32xf32> to vector<1x32xf32>
    %288 = tpu.concatenate %284, %287 in 0 : vector<1x32xf32>, vector<1x32xf32> -> vector<2x32xf32>
    %cst_93 = arith.constant 2.500000e-01 : f32
    %289 = vector.broadcast %cst_93 : f32 to vector<2x32xf32>
    %290 = arith.mulf %288, %289 : vector<2x32xf32>
    %c528 = arith.constant 528 : index
    %c0_94 = arith.constant 0 : index
    %291 = vector.load %arg4[%c528, %c0_94] : memref<640x32xf32, #tpu.memory_space<vmem>>, vector<64x32xf32>
    %c592 = arith.constant 592 : index
    %c0_95 = arith.constant 0 : index
    %292 = vector.load %arg4[%c592, %c0_95] : memref<640x32xf32, #tpu.memory_space<vmem>>, vector<1x32xf32>
    %293 = vector.extract_strided_slice %291 {offsets = [0, 0], sizes = [32, 32], strides = [1, 1]} : vector<64x32xf32> to vector<32x32xf32>
    %294 = arith.truncf %172 : vector<2x32xf32> to vector<2x32xbf16>
    %295 = arith.truncf %293 : vector<32x32xf32> to vector<32x32xbf16>
    %cst_96 = arith.constant dense<0.000000e+00> : vector<2x32xf32>
    %296 = tpu.matmul %294, %295, %cst_96 {dimension_numbers = #tpu.dot_dimension_numbers<[1], [0], [0], [1], [0, 0, 1, 1], [], []>} : vector<2x32xbf16>, vector<32x32xbf16>, vector<2x32xf32> -> vector<2x32xf32>
    %297 = vector.broadcast %292 : vector<1x32xf32> to vector<2x32xf32>
    %298 = arith.addf %297, %296 : vector<2x32xf32>
    %299 = vector.extract_strided_slice %291 {offsets = [32, 0], sizes = [32, 32], strides = [1, 1]} : vector<64x32xf32> to vector<32x32xf32>
    %300 = arith.truncf %290 : vector<2x32xf32> to vector<2x32xbf16>
    %301 = arith.truncf %299 : vector<32x32xf32> to vector<32x32xbf16>
    %cst_97 = arith.constant dense<0.000000e+00> : vector<2x32xf32>
    %302 = tpu.matmul %300, %301, %cst_97 {dimension_numbers = #tpu.dot_dimension_numbers<[1], [0], [0], [1], [0, 0, 1, 1], [], []>} : vector<2x32xbf16>, vector<32x32xbf16>, vector<2x32xf32> -> vector<2x32xf32>
    %303 = arith.addf %298, %302 : vector<2x32xf32>
    %cst_98 = arith.constant 0.000000e+00 : f32
    %304 = vector.broadcast %cst_98 : f32 to vector<2x32xf32>
    %305 = arith.maximumf %303, %304 : vector<2x32xf32>
    %c600 = arith.constant 600 : index
    %c0_99 = arith.constant 0 : index
    %306 = vector.load %arg4[%c600, %c0_99] : memref<640x32xf32, #tpu.memory_space<vmem>>, vector<32x4xf32>
    %307 = arith.truncf %305 : vector<2x32xf32> to vector<2x32xbf16>
    %308 = arith.truncf %306 : vector<32x4xf32> to vector<32x4xbf16>
    %cst_100 = arith.constant dense<0.000000e+00> : vector<2x4xf32>
    %309 = tpu.matmul %307, %308, %cst_100 {dimension_numbers = #tpu.dot_dimension_numbers<[1], [0], [0], [1], [0, 0, 1, 1], [], []>} : vector<2x32xbf16>, vector<32x4xbf16>, vector<2x4xf32> -> vector<2x4xf32>
    %c632 = arith.constant 632 : index
    %c0_101 = arith.constant 0 : index
    %310 = vector.load %arg4[%c632, %c0_101] : memref<640x32xf32, #tpu.memory_space<vmem>>, vector<1x4xf32>
    %311 = vector.broadcast %310 : vector<1x4xf32> to vector<2x4xf32>
    %312 = arith.addf %309, %311 : vector<2x4xf32>
    %cst_102 = arith.constant dense<0xFF800000> : vector<2xf32>
    %313 = vector.multi_reduction <maximumf>, %312, %cst_102 [1] : vector<2x4xf32> to vector<2xf32>
    %314 = vector.shape_cast %313 : vector<2xf32> to vector<2x1xf32>
    %315 = vector.broadcast %314 : vector<2x1xf32> to vector<2x4xf32>
    %316 = arith.subf %312, %315 : vector<2x4xf32>
    %317 = math.exp %316 : vector<2x4xf32>
    %cst_103 = arith.constant dense<0.000000e+00> : vector<2xf32>
    %318 = vector.multi_reduction <add>, %317, %cst_103 [1] : vector<2x4xf32> to vector<2xf32>
    %319 = vector.shape_cast %318 : vector<2xf32> to vector<2x1xf32>
    %320 = math.log %319 : vector<2x1xf32>
    %321 = arith.addf %320, %314 : vector<2x1xf32>
    %322 = vector.broadcast %321 : vector<2x1xf32> to vector<2x4xf32>
    %323 = arith.subf %312, %322 : vector<2x4xf32>
    %c0_104 = arith.constant 0 : index
    %c0_105 = arith.constant 0 : index
    %c0_106 = arith.constant 0 : index
    %324 = vector.load %arg5[%c0_104, %c0_105, %c0_106] : memref<1x2x4xf32, #tpu.memory_space<vmem>>, vector<1x2x4xf32>
    %325 = vector.shape_cast %324 : vector<1x2x4xf32> to vector<2x4xf32>
    %326 = vector.shape_cast %323 : vector<2x4xf32> to vector<1x2x4xf32>
    tpu.vector_store %arg5[%c0_104, %c0_105, %c0_106], %326 {strides = array<i32>} : memref<1x2x4xf32, #tpu.memory_space<vmem>>, vector<1x2x4xf32>,
    return
  }
  func.func @transform_0(%arg0: i32, %arg1: memref<2xi32, #tpu.memory_space<smem>>) -> (i32, i32, i32) {
    %c0_i32 = arith.constant 0 : i32
    %c0_i32_0 = arith.constant 0 : i32
    %c0_i32_1 = arith.constant 0 : i32
    return %arg0, %c0_i32, %c0_i32_0 : i32, i32, i32
  }
  func.func @transform_1(%arg0: i32, %arg1: memref<2xi32, #tpu.memory_space<smem>>) -> (i32, i32, i32) {
    %c0_i32 = arith.constant 0 : i32
    %c0_i32_0 = arith.constant 0 : i32
    %c0_i32_1 = arith.constant 0 : i32
    return %arg0, %c0_i32, %c0_i32_0 : i32, i32, i32
  }
  func.func @transform_2(%arg0: i32, %arg1: memref<2xi32, #tpu.memory_space<smem>>) -> (i32, i32) {
    %c0_i32 = arith.constant 0 : i32
    %c0_i32_0 = arith.constant 0 : i32
    %c0_i32_1 = arith.constant 0 : i32
    return %c0_i32, %c0_i32_0 : i32, i32
  }
  func.func @transform_3(%arg0: i32, %arg1: memref<2xi32, #tpu.memory_space<smem>>) -> (i32, i32, i32) {
    %c0_i32 = arith.constant 0 : i32
    %c0_i32_0 = arith.constant 0 : i32
    %c0_i32_1 = arith.constant 0 : i32
    return %arg0, %c0_i32, %c0_i32_0 : i32, i32, i32
  }
}

</mosaic_0001>

<bundles_post_ra>
// kernel: _lambda_.1
= control target key start
LH: loop header
LB: loop body
LE: loop exit
PB: predicated region body
PF: predicated region fallthrough
CT: control target
= control target key end

     0   :  { %s3177_s0 = inlined_call_operand.vmem [shape: s32[2], index: 0, kind: input, shape index: {}]   ;;  %s3178_s1 = inlined_call_operand.vmem [shape: f32[2,16,8], index: 1, kind: input, shape index: {}]   ;;  %s3179_s2 = inlined_call_operand.vmem [shape: bf16[2,16,16], index: 2, kind: input, shape index: {}]   ;;  %s3180_s3 = inlined_call_operand.hbm [shape: f32[640,32], index: 3, kind: input, shape index: {}]   ;;  %s3181_s4 = inlined_call_operand.hbm [shape: f32[1,2,4], index: 4, kind: output, shape index: {}]  }
   0x1   :  { %s9_s17 = sshll.u32 %s3177_s0, 4  ;;  %s10_s17 = int_to_ptr.vmem [resolvable:$true] %s9_s17 }
   0x2   :  { %s2786_s18 = scalar_lea.vmem %s10_s17, 16  ;;  %p2791_p1 = scmp.lt.s32.totalorder %s10_s17, %s10_s17 }
   0x3   :  { %p2787_p0 = scmp.ne.s32.totalorder %s10_s17, %s2786_s18  ;;  %p2792_p2 = scmp.lt.s32.totalorder %s2786_s18, %s2786_s18 }
   0x5   :  { %p2793_p3 = por %p2792_p2, %p2791_p1 }
   0x7   :  { %p2794_p4 = pnand %p2793_p3, %p2787_p0 }
   0x9   :  { %2797 = shalt.err (!%p2794_p4)  }
   0xa   :  { %s2844_s19 = smov [#allocation3]  }
   0xb   :  { %12 = dma.vmem_to_smem %s10_s17, 16, %s2844_s19, [#allocation2] }
   0xc   :  { %2838 = dma.done.wait [#allocation2], 16 }
   0xd   :  { %2839 = vsyncadd [#allocation2], 4294967280 }
   0xe   :  { %14 = sfence }
   0xf   :  { %15 = vsyncpa [#allocation5], 0 }
  0x10   :  { %16 = vsyncpa [#allocation6], 0  ;;  %s2845_s20 = smov [#allocation4]  }
  0x11   :  { %s26_s21 = sshll.u32 %s2845_s20, 4  ;;  %s27_s21 = int_to_ptr.vmem [resolvable:$true] %s26_s21 }
  0x12   :  { %s2806_s22 = scalar_lea.vmem %s27_s21, 10240  ;;  %p2811_p6 = scmp.lt.s32.totalorder %s27_s21, %s27_s21 }
  0x13   :  { %p2807_p5 = scmp.ne.s32.totalorder %s27_s21, %s2806_s22  ;;  %p2812_p7 = scmp.lt.s32.totalorder %s2806_s22, %s2806_s22 }
  0x15   :  { %p2813_p8 = por %p2812_p7, %p2811_p6 }
  0x17   :  { %p2814_p9 = pnand %p2813_p8, %p2807_p5 }
  0x19   :  { %2817 = shalt.err (!%p2814_p9)
}
  0x1a   :  { %s2846_s0 = smov 128   ;;  %s2847_s23 = smov 8  }
  0x1b   :  { %32 = dma.hbm_to_vmem [thread:$0]  %s3180_s3, 10240, %s27_s21, [#allocation5], %s2846_s0, %s2846_s0, %s2847_s23  }
  0x1c   :  { %2840 = dma.done.wait [#allocation5], 10240  }
  0x1d   :  { %2841 = vsyncadd [#allocation5], 4294957056  ;;  %v2304_v0 = vld [vmem:[%s3179_s2 + $0x8] sm:$0xff]   ;;  %vm72_vm0 = vcmask 130048   ;;  %v2889_v1 = vld [vmem:[%s3179_s2] sm:$0xff]   ;;  %v2848_v13 = vmov 0.0   ;;  %v38_v41 = vlaneseq }
  0x1e   :  { %v70_v2 = vunpack.c.l.bf16 %v2304_v0  ;;  %v65_v3 = vunpack.c.l.bf16 %v2889_v1  ;;  %v71_v4 = vunpack.c.h.bf16 %v2304_v0  ;;  %v66_v5 = vunpack.c.h.bf16 %v2889_v1  ;;  %v58_v10 = vld [vmem:[%s3178_s1] sm:$0xff]  ;;  %v59_v11 = vld [vmem:[%s3178_s1 + $0x8] sm:$0xff]  ;;  %v2302_v12 = vld [vmem:[%s3178_s1 + $0x10] sm:$0xff]  ;;  %2470 = vmatprep.subr.bf16.mxu0 %v2848_v13  ;;  %2476 = vmatprep.subr.bf16.mxu1 %v2848_v13  ;;  %s41_s11 = sld [smem:[#allocation3]] }
  0x1f   :  { %v2908_v14 = vpack.c.bf16 %v59_v11, %v58_v10  ;;  %v2303_v15 = vld [vmem:[%s3178_s1 + $0x18] sm:$0xff]  ;;  %vm2849_vm1 = vmmov 0   ;;  %v193_v17 = vld [vmem:[#allocation4 + $0x8] sm:$0xff]  ;;  %vm202_vm2 = vcmask 1043456   ;;  %vm195_vm3 = vcmask 64512   ;;  %v189_v38 = vld [vmem:[#allocation4] sm:$0xff] }
  0x20   :  { %v86_v6 = vsel %vm72_vm0, %v70_v2, 0.0  ;;  %v73_v7 = vsel %vm72_vm0, %v65_v3, 0.0  ;;  %v89_v8 = vsel %vm72_vm0, %v71_v4, 0.0  ;;  %v76_v9 = vsel %vm72_vm0, %v66_v5, 0.0  ;;  %2472 = vmatprep.mubr.msk.bf16.mxu0 %vm2849_vm1, %v2848_v13  ;;  %2478 = vmatprep.mubr.msk.bf16.mxu1 %vm2849_vm1, %v2848_v13  ;;  %s2299_s1 = sld [smem:[#allocation3 + $0x1]] }
  0x21   :  { %87 = vadd.xlane.f32.xlu1 %v86_v6  ;;  %74 = vadd.xlane.f32.xlu0 %v73_v7  ;;  %v2913_v16 = vpack.c.bf16 %v2303_v15, %v2302_v12  ;;  %v194_v18 = vpack.c.bf16 %v193_v17, %v193_v17  ;;  %v192_v39 = vpack.c.bf16 %v189_v38, %v189_v38  ;;  %v2850_v42 = vmov 0  }
  0x22   :  { %2471 = vmatpush3.bf16.msra.mxu0 %v2908_v14  ;;  %2743 = vset.pattern.permute.xlu1 %v2850_v42  ;;  %v39_v43 = vshrl.u32 %v38_v41, 7  ;;  %v442_v41 = vld [vmem:[#allocation4 + $0x38] sm:$0xff]  ;;  %vm448_vm8 = vcmask 261120   ;;  %vm593_vm9 = vcmask 1041408   ;;  %vm586_vm10 = vcmask 31744  }
  0x23   :  { %2477 = vmatpush3.bf16.msra.mxu1 %v2913_v16  ;;  %2724 = vmatprep.subr.msk.bf16.mxu0 %vm202_vm2, %v194_v18  ;;  %v204_v37 = vsel %vm202_vm2, %v194_v18, 0  ;;  %v262_v40 = vsel %vm202_vm2, %v192_v39, 0  ;;  %vm1203_vm11 = vcmask 1040384   ;;  %vm1564_vm12 = vcmask 27648  }
  0x24   :  { %2725 = vmatprep.subr.msk.bf16.mxu1 %vm202_vm2, %v192_v39  ;;  %2737 = vset.pattern.permute.xlu0 %v2850_v42  ;;  %v40_v44 = vadd.s32 8, %v39_v43  ;;  %v42_v46 = vstv %s41_s11  ;;  %v443_v42 = vld [vmem:[#allocation4 + $0x40] sm:$0xff]  ;;  %vm2084_vm13 = vcmask 257024   ;;  %vm2267_vm14 = vcmask 25600  }
  0x25   :  { %90 = vadd.xlane.f32.xlu1 %v89_v8  ;;  %77 = vadd.xlane.f32.xlu0 %v76_v9  ;;  %vm43_vm6 = vcmp.lt.s32.totalorder %v39_v43, %v42_v46 }
  0x26   :  { %v51_v45 = vstv %s2299_s1  ;;  %vm44_vm7 = vcmp.lt.s32.totalorder %v40_v44, %v42_v46  ;;  %v2297_v50 = vsel %vm43_vm6, 1.0, %v2848_v13 }
  0x27   :  { %vm52_vm4 = vcmp.lt.s32.totalorder %v39_v43, %v51_v45  ;;  %vm53_vm5 = vcmp.lt.s32.totalorder %v40_v44, %v51_v45  ;;  %v2298_v51 = vsel %vm44_vm7, 1.0, %v2848_v13  ;;  %v446_v43 = vpack.c.bf16 %v443_v42, %v442_v41  ;;  %v436_v44 = vld [vmem:[#allocation4 + $0x28] sm:$0xff]  ;;  %v437_v45 = vld [vmem:[#allocation4 + $0x30] sm:$0xff] }
  0x28   :  { %v2300_v47 = vsel %vm52_vm4, 1.0, %v2848_v13  ;;  %v2301_v48 = vsel %vm53_vm5, 1.0, %v2848_v13  ;;  %v2738_v52 = vpack.i.bf16 %v2298_v51, %v2297_v50  ;;  %v441_v46 = vpack.c.bf16 %v437_v45, %v436_v44  ;;  %v578_v50 = vld [vmem:[#allocation4 + $0x70] sm:$0xff]  ;;  %v579_v51 = vld [vmem:[#allocation4 + $0x78] sm:$0xff] }
  0x29   :  { %v2744_v49 = vpack.i.bf16 %v2301_v48, %v2300_v47  ;;  %v434_v47 = vld [vmem:[#allocation4 + $0x18] sm:$0xff]  ;;  %v435_v48 = vld [vmem:[#allocation4 + $0x20] sm:$0xff] }
  0x36   :  { %2745 = vperm.xlu1 %2743, %v2744_v49   ;;  %v440_v49 = vpack.c.bf16 %v435_v48, %v434_v47 }
  0x3b   :  { %2739 = vperm.xlu0 %2737, %v2738_v52   ;;  %v582_v52 = vpack.c.bf16 %v579_v51, %v578_v50 }
  0xaa   :  { %v88_v19 = vpop.xlane.xlu1 %87  ;;  %v75_v20 = vpop.xlane.xlu0 %74 }
  0xab   :  { %v92_v21 = vmax.f32 %v88_v19, 1.0  ;;  %v79_v22 = vmax.f32 %v75_v20, 1.0 }
  0xad   :  { %2753 = vrcp.f32 %v92_v21 }
  0xae   :  { %v91_v23 = vpop.xlane.xlu1 %90  ;;  %v78_v24 = vpop.xlane.xlu0 %77  ;;  %2755 = vrcp.f32 %v79_v22 }
  0xaf   :  { %v93_v25 = vmax.f32 %v91_v23, 1.0  ;;  %v80_v26 = vmax.f32 %v78_v24, 1.0 }
  0xb1   :  { %2757 = vrcp.f32 %v93_v25 }
  0xb2   :  { %2759 = vrcp.f32 %v80_v26 }
  0xb6   :  { %v2740_v8 = vpop.permute.xlu0 %2739 }
  0xb7   :  { %v2959_v19 = vunpack.i.l.bf16 %v2740_v8  ;;  %v2962_v24 = vunpack.i.h.bf16 %v2740_v8  ;;  %v580_v8 = vld [vmem:[#allocation4 + $0x80] sm:$0xf] }
  0xba   :  { %v2754_v27 = vpop.eup %2753 }
  0xbb   :  { %v2756_v28 = vpop.eup %2755  ;;  %v96_v31 = vmul.f32 %v2754_v27, %v70_v2 }
  0xbc   :  { %v83_v33 = vmul.f32 %v2756_v28, %v65_v3  ;;  %v2312_v3 = vld [vmem:[#allocation4 + $0x10] ss:$0 sm:$0xff] }
  0xbe   :  { %v2758_v29 = vpop.eup %2757 }
  0xbf   :  { %v2760_v30 = vpop.eup %2759  ;;  %v97_v32 = vmul.f32 %v2758_v29, %v71_v4  ;;  %v2746_v4 = vpop.permute.xlu1 %2745 }
  0xc0   :  { %v84_v34 = vmul.f32 %v2760_v30, %v66_v5  ;;  %v2955_v11 = vunpack.i.l.bf16 %v2746_v4  ;;  %v2957_v17 = vunpack.i.h.bf16 %v2746_v4 }
  0xc1   :  { %v2922_v35 = vpack.c.bf16 %v97_v32, %v96_v31  ;;  %v444_v32 = vld [vmem:[#allocation4 + $0x48] sm:$0xff] }
  0xc2   :  { %v2924_v36 = vpack.c.bf16 %v84_v34, %v83_v33  ;;  %v445_v33 = vld [vmem:[#allocation4 + $0x50] sm:$0xff] }
  0xc3   :  { %2479 = vmatmul.mubr.msk.bf16.vlgmr.msra.gmra.mxu1 %vm72_vm0, %v2922_v35  ;;  %v447_v39 = vpack.c.bf16 %v445_v33, %v444_v32 }
  0xc4   :  { %2473 = vmatmul.mubr.msk.bf16.vlgmr.msra.gmra.mxu0 %vm72_vm0, %v2924_v36  ;;  %2489 = vmatpush3.bf16.msra.mxu1 %v262_v40 }
  0xc5   :  { %2483 = vmatpush3.bf16.msra.mxu0 %v204_v37  ;;  %2484 = vmatprep.mubr.msk.bf16.mxu0 %vm195_vm3, %v2908_v14 }
  0xc6   :  { %2494 = vmatprep.subr.bf16.mxu0 %v2848_v13  ;;  %2500 = vmatprep.subr.bf16.mxu1 %v2848_v13 }
  0xcc   :  { %2485 = vmatmul.mubr.msk.bf16.vlgmr.msra.gmra.mxu0 %vm195_vm3, %v2913_v16 }
  0xcd   :  { %2496 = vmatprep.mubr.msk.bf16.mxu0 %vm2849_vm1, %v2848_v13 }
 0x183   :  { %v182_v53 = vpop.f32.mrf.mxu1 }
 0x184   :  { %v137_v54 = vpop.f32.mrf.mxu0 }
 0x185   :  { %v2480_v55 = vpop.f32.mrf.mxu1 }
 0x186   :  { %v2474_v56 = vpop.f32.mrf.mxu0 }
 0x187   :  { %v185_v57 = vpop.f32.mrf.mxu1 }
 0x188   :  { %v140_v58 = vpop.f32.mrf.mxu0  ;;  %v2945_v59 = vpack.c.bf16 %v185_v57, %v182_v53 }
 0x189   :  { %v2947_v60 = vpack.c.bf16 %v140_v58, %v137_v54  ;;  %v2481_v61 = vpop.f32.mrf.mxu1  ;;  %v576_v58 = vld [vmem:[#allocation4 + $0x60] sm:$0xff] }
 0x18a   :  { %v2475_v62 = vpop.f32.mrf.mxu0  ;;  %v577_v61 = vld [vmem:[#allocation4 + $0x68] sm:$0xff] }
 0x18b   :  { %2490 = vmatprep.mubr.msk.bf16.mxu1 %vm195_vm3, %v2947_v60  ;;  %v581_v4 = vpack.c.bf16 %v577_v61, %v576_v58 }
 0x18c   :  { %2491 = vmatmul.mubr.msk.bf16.vlgmr.msra.gmra.mxu1 %vm195_vm3, %v2945_v59  ;;  %v2486_v63 = vpop.f32.mrf.mxu0 }
 0x18d   :  { %2502 = vmatprep.mubr.msk.bf16.mxu1 %vm2849_vm1, %v2848_v13 }
 0x18e   :  { %v240_v0 = vpop.f32.mrf.mxu0 }
 0x190   :  { %v2487_v5 = vpop.f32.mrf.mxu0 }
 0x192   :  { %v243_v20 = vpop.f32.mrf.mxu0 }
 0x24c   :  { %v2492_v2 = vpop.f32.mrf.mxu1 }
 0x24d   :  { %v307_v6 = vadd.f32 %v2492_v2, %v2486_v63 }
 0x24e   :  { %v298_v7 = vpop.f32.mrf.mxu1 }
 0x24f   :  { %v320_v9 = vadd.f32 %v2312_v3, %v307_v6  ;;  %v299_v10 = vadd.f32 %v298_v7, %v240_v0 }
 0x250   :  { %v2493_v12 = vpop.f32.mrf.mxu1 }
 0x251   :  { %v318_v15 = vadd.f32 %v2312_v3, %v299_v10  ;;  %v310_v18 = vadd.f32 %v2493_v12, %v2487_v5  ;;  %v344_v23 = vmul.f32 %v2955_v11, %v320_v9  ;;  %v704_v5 = vld [vmem:[#allocation4 + $0x90] sm:$0xff]  ;;  %v585_v9 = vpack.c.bf16 %v580_v8, %v580_v8  ;;  %v706_v12 = vld [vmem:[#allocation4 + $0x98] sm:$0xff] }
 0x252   :  { %v301_v21 = vpop.f32.mrf.mxu1  ;;  %v705_v6 = vpack.c.bf16 %v704_v5, %v704_v5  ;;  %v2329_v5 = vld [vmem:[#allocation4 + $0xa0] ss:$0 sm:$0xff] }
 0x253   :  { %v321_v22 = vadd.f32 %v2312_v3, %v310_v18  ;;  %v302_v25 = vadd.f32 %v301_v21, %v243_v20  ;;  %v342_v28 = vmul.f32 %v2959_v19, %v318_v15  ;;  %v348_v29 = vmax.f32 %v344_v23, 0.0  ;;  %v2319_v23 = vld [vmem:[#allocation4 + $0x58] ss:$0 sm:$0xff] }
 0x254   :  { %v761_v7 = vsel %vm202_vm2, %v705_v6, 0  ;;  %v595_v10 = vsel %vm593_vm9, %v585_v9, 0  ;;  %v707_v15 = vpack.c.bf16 %v706_v12, %v706_v12 }
 0x255   :  { %v345_v26 = vmul.f32 %v2957_v17, %v321_v22  ;;  %v319_v27 = vadd.f32 %v2312_v3, %v302_v25  ;;  %v346_v37 = vmax.f32 %v342_v28, 0.0 }
 0x256   :  { %v709_v47 = vsel %vm202_vm2, %v707_v15, 0 }
 0x257   :  { %v349_v30 = vmax.f32 %v345_v26, 0.0  ;;  %v343_v31 = vmul.f32 %v2962_v24, %v319_v27 }
 0x259   :  { %v392_v34 = vpack.c.bf16 %v349_v30, %v348_v29  ;;  %v347_v38 = vmax.f32 %v343_v31, 0.0 }
 0x25b   :  { %v350_v40 = vpack.c.bf16 %v347_v38, %v346_v37  ;;  %2501 = vmatpush3.bf16.msra.mxu1 %v392_v34 }
 0x25c   :  { %2514 = vmatprep.subr.bf16.mxu1 %v441_v46 }
 0x25d   :  { %2495 = vmatpush3.bf16.msra.mxu0 %v350_v40 }
 0x25e   :  { %2503 = vmatmul.mubr.msk.bf16.vlgmr.msra.gmra.mxu1 %vm72_vm0, %v2922_v35  ;;  %2506 = vmatprep.subr.bf16.mxu0 %v447_v39 }
 0x25f   :  { %2515 = vmatpush3.bf16.msra.mxu1 %v441_v46 }
 0x260   :  { %2497 = vmatmul.mubr.msk.bf16.vlgmr.msra.gmra.mxu0 %vm72_vm0, %v2924_v36  ;;  %2516 = vmatprep.subr.bf16.mxu1 %v440_v49 }
 0x261   :  { %2507 = vmatpush3.bf16.msra.mxu0 %v447_v39  ;;  %2510 = vmatprep.mubr.msk.bf16.mxu0 %vm448_vm8, %v350_v40 }
 0x262   :  { %2508 = vmatprep.subr.bf16.mxu0 %v446_v43 }
 0x263   :  { %2517 = vmatpush3.bf16.msra.mxu1 %v440_v49 }
 0x264   :  { %2528 = vmatprep.subr.bf16.mxu1 %v582_v52 }
 0x265   :  { %2509 = vmatpush3.bf16.msra.mxu0 %v446_v43 }
 0x266   :  { %2726 = vmatprep.subr.msk.bf16.mxu0 %vm593_vm9, %v585_v9 }
 0x268   :  { %2511 = vmatmul.mubr.msk.bf16.vlgmr.msra.gmra.mxu0 %vm448_vm8, %v392_v34 }
 0x269   :  { %2523 = vmatpush3.bf16.msra.mxu0 %v595_v10 }
 0x26a   :  { %2727 = vmatprep.subr.msk.bf16.mxu0 %vm202_vm2, %v707_v15 }
 0x31e   :  { %v427_v53 = vpop.f32.mrf.mxu1 }
 0x320   :  { %v385_v54 = vpop.f32.mrf.mxu0  ;;  %v2504_v55 = vpop.f32.mrf.mxu1 }
 0x322   :  { %v2498_v56 = vpop.f32.mrf.mxu0  ;;  %v430_v57 = vpop.f32.mrf.mxu1 }
 0x323   :  { %v439_v2 = vpack.c.bf16 %v430_v57, %v427_v53  ;;  %v2324_v53 = vld [vmem:[#allocation4 + $0x88] ss:$0 sm:$0xff] }
 0x324   :  { %v388_v62 = vpop.f32.mrf.mxu0  ;;  %v2505_v63 = vpop.f32.mrf.mxu1 }
 0x325   :  { %v438_v0 = vpack.c.bf16 %v388_v62, %v385_v54 }
 0x326   :  { %v2499_v3 = vpop.f32.mrf.mxu0 }
 0x327   :  { %2518 = vmatprep.mubr.msk.bf16.mxu1 %vm448_vm8, %v438_v0 }
 0x328   :  { %2519 = vmatmul.mubr.msk.bf16.vlgmr.msra.gmra.mxu1 %vm448_vm8, %v439_v2 }
 0x329   :  { %2529 = vmatpush3.bf16.msra.mxu1 %v582_v52  ;;  %2532 = vmatprep.mubr.msk.bf16.mxu1 %vm448_vm8, %v350_v40 }
 0x32a   :  { %2530 = vmatprep.subr.bf16.mxu1 %v581_v4 }
 0x32d   :  { %2531 = vmatpush3.bf16.msra.mxu1 %v581_v4 }
 0x32e   :  { %2728 = vmatprep.subr.msk.bf16.mxu1 %vm202_vm2, %v705_v6 }
 0x330   :  { %2533 = vmatmul.mubr.msk.bf16.vlgmr.msra.gmra.mxu1 %vm448_vm8, %v392_v34 }
 0x331   :  { %2544 = vmatprep.mubr.msk.bf16.mxu1 %vm195_vm3, %v2947_v60  ;;  %2543 = vmatpush3.bf16.msra.mxu1 %v761_v7  ;;  %v2512_v60 = vpop.f32.mrf.mxu0 }
 0x332   :  { %2554 = vmatprep.subr.bf16.mxu1 %v2848_v13 }
 0x333   :  { %v489_v18 = vpop.f32.mrf.mxu0 }
 0x335   :  { %v2513_v21 = vpop.f32.mrf.mxu0 }
 0x337   :  { %v492_v29 = vpop.f32.mrf.mxu0 }
 0x338   :  { %2545 = vmatmul.mubr.msk.bf16.vlgmr.msra.gmra.mxu1 %vm195_vm3, %v2945_v59 }
 0x339   :  { %2556 = vmatprep.mubr.msk.bf16.mxu1 %vm2849_vm1, %v2848_v13 }
 0x3e8   :  { %v2520_v20 = vpop.f32.mrf.mxu1 }
 0x3e9   :  { %v553_v59 = vadd.f32 %v2520_v20, %v2512_v60 }
 0x3ea   :  { %v544_v22 = vpop.f32.mrf.mxu1 }
 0x3eb   :  { %v545_v25 = vadd.f32 %v544_v22, %v489_v18  ;;  %v566_v30 = vadd.f32 %v2319_v23, %v553_v59 }
 0x3ec   :  { %v2521_v26 = vpop.f32.mrf.mxu1 }
 0x3ed   :  { %v564_v27 = vadd.f32 %v2319_v23, %v545_v25  ;;  %v556_v28 = vadd.f32 %v2521_v26, %v2513_v21  ;;  %v570_v39 = vmul.f32 %v2955_v11, %v566_v30 }
 0x3ee   :  { %v547_v31 = vpop.f32.mrf.mxu1 }
 0x3ef   :  { %v567_v32 = vadd.f32 %v2319_v23, %v556_v28  ;;  %v548_v33 = vadd.f32 %v547_v31, %v492_v29  ;;  %v568_v34 = vmul.f32 %v2959_v19, %v564_v27  ;;  %v574_v44 = vmax.f32 %v570_v39, 0.0 }
 0x3f0   :  { %v2534_v48 = vpop.f32.mrf.mxu1 }
 0x3f1   :  { %v571_v37 = vmul.f32 %v2957_v17, %v567_v32  ;;  %v565_v38 = vadd.f32 %v2319_v23, %v548_v33  ;;  %v572_v42 = vmax.f32 %v568_v34, 0.0  ;;  %v923_v32 = vld [vmem:[#allocation4 + $0xd8] sm:$0xff]  ;;  %v924_v33 = vld [vmem:[#allocation4 + $0xe0] sm:$0xff] }
 0x3f2   :  { %v680_v49 = vpop.f32.mrf.mxu1  ;;  %v926_v39 = vpack.c.bf16 %v924_v33, %v923_v32 }
 0x3f3   :  { %v569_v40 = vmul.f32 %v2962_v24, %v565_v38  ;;  %v575_v41 = vmax.f32 %v571_v37, 0.0 }
 0x3f4   :  { %v2535_v50 = vpop.f32.mrf.mxu1 }
 0x3f5   :  { %v573_v43 = vmax.f32 %v569_v40, 0.0  ;;  %v584_v46 = vpack.c.bf16 %v575_v41, %v574_v44  ;;  %v921_v41 = vld [vmem:[#allocation4 + $0xc8] sm:$0xff]  ;;  %v915_v44 = vld [vmem:[#allocation4 + $0xb8] sm:$0xff] }
 0x3f6   :  { %v683_v51 = vpop.f32.mrf.mxu1 }
 0x3f7   :  { %v583_v45 = vpack.c.bf16 %v573_v43, %v572_v42  ;;  %v922_v42 = vld [vmem:[#allocation4 + $0xd0] sm:$0xff] }
 0x3f8   :  { %v2546_v55 = vpop.f32.mrf.mxu1  ;;  %v925_v43 = vpack.c.bf16 %v922_v42, %v921_v41 }
 0x3f9   :  { %2524 = vmatprep.mubr.msk.bf16.mxu0 %vm586_vm10, %v583_v45  ;;  %v916_v45 = vld [vmem:[#allocation4 + $0xc0] sm:$0xff] }
 0x3fa   :  { %2525 = vmatmul.mubr.msk.bf16.vlgmr.msra.gmra.mxu0 %vm586_vm10, %v584_v46  ;;  %v920_v46 = vpack.c.bf16 %v916_v45, %v915_v44 }
 0x3fb   :  { %2537 = vmatpush3.bf16.msra.mxu0 %v709_v47  ;;  %2538 = vmatprep.mubr.msk.bf16.mxu0 %vm195_vm3, %v2908_v14  ;;  %v913_v47 = vld [vmem:[#allocation4 + $0xa8] sm:$0xff] }
 0x3fc   :  { %2548 = vmatprep.subr.bf16.mxu0 %v2848_v13 }
 0x402   :  { %2539 = vmatmul.mubr.msk.bf16.vlgmr.msra.gmra.mxu0 %vm195_vm3, %v2913_v16  ;;  %v797_v16 = vpop.f32.mrf.mxu1 }
 0x403   :  { %2550 = vmatprep.mubr.msk.bf16.mxu0 %vm2849_vm1, %v2848_v13 }
 0x404   :  { %v2547_v8 = vpop.f32.mrf.mxu1 }
 0x406   :  { %v800_v21 = vpop.f32.mrf.mxu1 }
 0x4ba   :  { %v2526_v52 = vpop.f32.mrf.mxu0 }
 0x4bb   :  { %v689_v54 = vadd.f32 %v2534_v48, %v2526_v52 }
 0x4bc   :  { %v631_v56 = vpop.f32.mrf.mxu0 }
 0x4bd   :  { %v681_v57 = vadd.f32 %v680_v49, %v631_v56  ;;  %v3003_v58 = vadd.f32 %v2324_v53, %v689_v54  ;;  %v1056_v49 = vld [vmem:[#allocation4 + $0x100] sm:$0xff] }
 0x4be   :  { %v2527_v14 = vpop.f32.mrf.mxu0 }
 0x4bf   :  { %v692_v61 = vadd.f32 %v2535_v50, %v2527_v14  ;;  %v3005_v62 = vadd.f32 %v2324_v53, %v681_v57 }
 0x4c0   :  { %v634_v63 = vpop.f32.mrf.mxu0 }
 0x4c1   :  { %v684_v0 = vadd.f32 %v683_v51, %v634_v63  ;;  %v1206_v2 = vsel %vm586_vm10, %v3005_v62, -inf  ;;  %v3009_v3 = vadd.f32 %v2324_v53, %v692_v61  ;;  %v1212_v63 = vsel %vm586_vm10, %v3003_v58, -inf }
 0x4c2   :  { %1207 = vmax.xlane.f32.xlu1 %v1206_v2  ;;  %v2540_v4 = vpop.f32.mrf.mxu0 }
 0x4c3   :  { %v806_v6 = vadd.f32 %v2546_v55, %v2540_v4  ;;  %v701_v7 = vadd.f32 %v2324_v53, %v684_v0 }
 0x4c4   :  { %v745_v9 = vpop.f32.mrf.mxu0 }
 0x4c5   :  { %v819_v10 = vadd.f32 %v2329_v5, %v806_v6  ;;  %v798_v12 = vadd.f32 %v797_v16, %v745_v9  ;;  %v1209_v15 = vsel %vm586_vm10, %v701_v7, -inf }
 0x4c6   :  { %v2541_v60 = vpop.f32.mrf.mxu0  ;;  %1210 = vmax.xlane.f32.xlu0 %v1209_v15 }
 0x4c7   :  { %v817_v18 = vadd.f32 %v2329_v5, %v798_v12  ;;  %v809_v20 = vadd.f32 %v2547_v8, %v2541_v60  ;;  %v823_v22 = vmul.f32 %v2955_v11, %v819_v10  ;;  %v1055_v8 = vld [vmem:[#allocation4 + $0xf8] sm:$0xff] }
 0x4c8   :  { %v748_v59 = vpop.f32.mrf.mxu0 }
 0x4c9   :  { %v820_v23 = vadd.f32 %v2329_v5, %v809_v20  ;;  %v801_v25 = vadd.f32 %v800_v21, %v748_v59  ;;  %v821_v26 = vmul.f32 %v2959_v19, %v817_v18  ;;  %v827_v29 = vmax.f32 %v823_v22, 0.0  ;;  %v1060_v20 = vld [vmem:[#allocation4 + $0x120] sm:$0xff]  ;;  %v1061_v21 = vld [vmem:[#allocation4 + $0x128] sm:$0xff] }
 0x4ca   :  { %v1067_v59 = vpack.c.bf16 %v1061_v21, %v1060_v20 }
 0x4cb   :  { %v824_v27 = vmul.f32 %v2957_v17, %v820_v23  ;;  %v818_v28 = vadd.f32 %v2329_v5, %v801_v25  ;;  %v825_v34 = vmax.f32 %v821_v26, 0.0  ;;  %v1058_v23 = vld [vmem:[#allocation4 + $0x110] sm:$0xff]  ;;  %v1059_v25 = vld [vmem:[#allocation4 + $0x118] sm:$0xff] }
 0x4cc   :  { %v1066_v26 = vpack.c.bf16 %v1059_v25, %v1058_v23 }
 0x4cd   :  { %v828_v30 = vmax.f32 %v824_v27, 0.0  ;;  %v822_v31 = vmul.f32 %v2962_v24, %v818_v28 }
 0x4cf   :  { %v3016_v37 = vpack.c.bf16 %v828_v30, %v827_v29  ;;  %v826_v38 = vmax.f32 %v822_v31, 0.0 }
 0x4d1   :  { %v829_v40 = vpack.c.bf16 %v826_v38, %v825_v34  ;;  %2555 = vmatpush3.bf16.msra.mxu1 %v3016_v37 }
 0x4d2   :  { %2568 = vmatprep.subr.bf16.mxu1 %v920_v46 }
 0x4d3   :  { %2549 = vmatpush3.bf16.msra.mxu0 %v829_v40 }
 0x4d4   :  { %2557 = vmatmul.mubr.msk.bf16.vlgmr.msra.gmra.mxu1 %vm72_vm0, %v2922_v35  ;;  %2560 = vmatprep.subr.bf16.mxu0 %v926_v39  ;;  %v914_v35 = vld [vmem:[#allocation4 + $0xb0] sm:$0xff] }
 0x4d5   :  { %2569 = vmatpush3.bf16.msra.mxu1 %v920_v46  ;;  %v919_v48 = vpack.c.bf16 %v914_v35, %v913_v47 }
 0x4d6   :  { %2551 = vmatmul.mubr.msk.bf16.vlgmr.msra.gmra.mxu0 %vm72_vm0, %v2924_v36  ;;  %v1057_v36 = vld [vmem:[#allocation4 + $0x108] sm:$0xff] }
 0x4d7   :  { %2561 = vmatpush3.bf16.msra.mxu0 %v926_v39  ;;  %2564 = vmatprep.mubr.msk.bf16.mxu0 %vm448_vm8, %v829_v40  ;;  %v1063_v50 = vpack.c.bf16 %v1057_v36, %v1056_v49  ;;  %v2336_v36 = vld [vmem:[#allocation4 + $0xe8] ss:$0 sm:$0xff] }
 0x4d8   :  { %2562 = vmatprep.subr.bf16.mxu0 %v925_v43  ;;  %2570 = vmatprep.subr.bf16.mxu1 %v919_v48 }
 0x4d9   :  { %2571 = vmatpush3.bf16.msra.mxu1 %v919_v48 }
 0x4da   :  { %2584 = vmatprep.subr.bf16.mxu1 %v1063_v50 }
 0x4db   :  { %2563 = vmatpush3.bf16.msra.mxu0 %v925_v43 }
 0x4dc   :  { %2576 = vmatprep.subr.bf16.mxu0 %v1067_v59 }
 0x4de   :  { %2565 = vmatmul.mubr.msk.bf16.vlgmr.msra.gmra.mxu0 %vm448_vm8, %v3016_v37 }
 0x4df   :  { %2577 = vmatpush3.bf16.msra.mxu0 %v1067_v59 }
 0x4e0   :  { %2578 = vmatprep.subr.bf16.mxu0 %v1066_v26 }
 0x4e3   :  { %2579 = vmatpush3.bf16.msra.mxu0 %v1066_v26 }
 0x4e4   :  { %2592 = vmatprep.subr.bf16.mxu0 %v2848_v13 }
 0x54b   :  { %v1208_v51 = vpop.xlane.xlu1 %1207 }
 0x54c   :  { %v1218_v52 = vsub.f32 %v3005_v62, %v1208_v51  ;;  %v1215_v62 = vsel %vm586_vm10, %v3009_v3, -inf }
 0x54e   :  { %v1222_v53 = vmul.f32 1.442695, %v1218_v52 }
 0x54f   :  { %v1211_v54 = vpop.xlane.xlu0 %1210 }
 0x550   :  { %2761 = vpow2.f32 %v1222_v53  ;;  %v1219_v55 = vsub.f32 %v701_v7, %v1211_v54  ;;  %v1054_v7 = vld [vmem:[#allocation4 + $0xf0] sm:$0xff] }
 0x551   :  { %v1062_v18 = vpack.c.bf16 %v1055_v8, %v1054_v7 }
 0x552   :  { %v1224_v56 = vmul.f32 1.442695, %v1219_v55 }
 0x554   :  { %2763 = vpow2.f32 %v1224_v56 }
 0x55d   :  { %v2762_v57 = vpop.eup %2761 }
 0x55e   :  { %v1230_v14 = vsel %vm586_vm10, %v2762_v57, 0.0 }
 0x55f   :  { %1231 = vadd.xlane.f32.xlu1 %v1230_v14 }
 0x561   :  { %v2764_v61 = vpop.eup %2763 }
 0x562   :  { %v1233_v16 = vsel %vm586_vm10, %v2764_v61, 0.0 }
 0x563   :  { %1234 = vadd.xlane.f32.xlu1 %v1233_v16 }
 0x567   :  { %1213 = vmax.xlane.f32.xlu1 %v1212_v63 }
 0x56b   :  { %1216 = vmax.xlane.f32.xlu1 %v1215_v62 }
 0x594   :  { %v906_v0 = vpop.f32.mrf.mxu1 }
 0x596   :  { %v864_v2 = vpop.f32.mrf.mxu0  ;;  %v2558_v4 = vpop.f32.mrf.mxu1 }
 0x598   :  { %v2552_v5 = vpop.f32.mrf.mxu0  ;;  %v909_v6 = vpop.f32.mrf.mxu1 }
 0x599   :  { %v918_v15 = vpack.c.bf16 %v909_v6, %v906_v0 }
 0x59a   :  { %v867_v9 = vpop.f32.mrf.mxu0  ;;  %v2559_v10 = vpop.f32.mrf.mxu1 }
 0x59b   :  { %v917_v12 = vpack.c.bf16 %v867_v9, %v864_v2 }
 0x59c   :  { %v2553_v60 = vpop.f32.mrf.mxu0 }
 0x59d   :  { %2572 = vmatprep.mubr.msk.bf16.mxu1 %vm448_vm8, %v917_v12 }
 0x59e   :  { %2573 = vmatmul.mubr.msk.bf16.vlgmr.msra.gmra.mxu1 %vm448_vm8, %v918_v15  ;;  %v2566_v45 = vpop.f32.mrf.mxu0 }
 0x59f   :  { %2585 = vmatpush3.bf16.msra.mxu1 %v1063_v50  ;;  %2588 = vmatprep.mubr.msk.bf16.mxu1 %vm448_vm8, %v829_v40 }
 0x5a0   :  { %2586 = vmatprep.subr.bf16.mxu1 %v1062_v18  ;;  %v967_v46 = vpop.f32.mrf.mxu0 }
 0x5a2   :  { %v2567_v35 = vpop.f32.mrf.mxu0 }
 0x5a3   :  { %2587 = vmatpush3.bf16.msra.mxu1 %v1062_v18 }
 0x5a4   :  { %2598 = vmatprep.subr.bf16.mxu1 %v2848_v13  ;;  %v970_v54 = vpop.f32.mrf.mxu0 }
 0x5a6   :  { %2589 = vmatmul.mubr.msk.bf16.vlgmr.msra.gmra.mxu1 %vm448_vm8, %v3016_v37 }
 0x5a7   :  { %2600 = vmatprep.mubr.msk.bf16.mxu1 %vm2849_vm1, %v2848_v13 }
 0x5e8   :  { %v1232_v22 = vpop.xlane.xlu1 %1231 }
 0x5e9   :  { %2765 = vrcp.f32 %v1232_v22 }
 0x5ec   :  { %v1235_v27 = vpop.xlane.xlu1 %1234 }
 0x5ed   :  { %2767 = vrcp.f32 %v1235_v27 }
 0x5f0   :  { %v1214_v28 = vpop.xlane.xlu1 %1213 }
 0x5f1   :  { %v1220_v29 = vsub.f32 %v3003_v58, %v1214_v28 }
 0x5f3   :  { %v1226_v30 = vmul.f32 1.442695, %v1220_v29 }
 0x5f4   :  { %v1217_v31 = vpop.xlane.xlu1 %1216 }
 0x5f5   :  { %2769 = vpow2.f32 %v1226_v30  ;;  %v1221_v32 = vsub.f32 %v3009_v3, %v1217_v31 }
 0x5f6   :  { %v2766_v33 = vpop.eup %2765 }
 0x5f7   :  { %v1228_v34 = vmul.f32 1.442695, %v1221_v32  ;;  %v1243_v37 = vmul.f32 %v2766_v33, %v2762_v57  ;;  %v2341_v32 = vld [vmem:[#allocation4 + $0x130] ss:$0 sm:$0xff] }
 0x5f9   :  { %2771 = vpow2.f32 %v1228_v34  ;;  %v1254_v40 = vmul.f32 %v2959_v19, %v1243_v37 }
 0x5fa   :  { %v2768_v38 = vpop.eup %2767 }
 0x5fb   :  { %v1245_v39 = vmul.f32 %v2768_v38, %v2764_v61 }
 0x5fd   :  { %v1255_v41 = vmul.f32 %v2962_v24, %v1245_v39 }
 0x5ff   :  { %v1258_v42 = vpack.c.bf16 %v1255_v41, %v1254_v40 }
 0x601   :  { %1260 = vxpose.xlu0.c.b16.start.end [1/1] (short) (narrow) %v1258_v42, 16  ;;  %2599 = vmatpush3.bf16.msra.mxu1 %v1258_v42 }
 0x602   :  { %v2770_v43 = vpop.eup %2769  ;;  %2610 = vmatprep.subr.bf16.mxu1 %v2848_v13 }
 0x603   :  { %v1236_v58 = vsel %vm586_vm10, %v2770_v43, 0.0 }
 0x604   :  { %1237 = vadd.xlane.f32.xlu1 %v1236_v58  ;;  %2601 = vmatmul.mubr.msk.bf16.vlgmr.msra.gmra.mxu1 %vm72_vm0, %v2889_v1 }
 0x605   :  { %2612 = vmatprep.mubr.msk.bf16.mxu1 %vm2849_vm1, %v2848_v13 }
 0x606   :  { %v2772_v3 = vpop.eup %2771 }
 0x607   :  { %v1239_v44 = vsel %vm586_vm10, %v2772_v3, 0.0 }
 0x608   :  { %1240 = vadd.xlane.f32.xlu1 %v1239_v44 }
 0x65e   :  { %v2574_v47 = vpop.f32.mrf.mxu1 }
 0x65f   :  { %v1031_v48 = vadd.f32 %v2574_v47, %v2566_v45 }
 0x660   :  { %v1022_v49 = vpop.f32.mrf.mxu1 }
 0x661   :  { %v1023_v50 = vadd.f32 %v1022_v49, %v967_v46  ;;  %v1044_v1 = vadd.f32 %v2336_v36, %v1031_v48 }
 0x662   :  { %v2575_v51 = vpop.f32.mrf.mxu1 }
 0x663   :  { %v1042_v52 = vadd.f32 %v2336_v36, %v1023_v50  ;;  %v1034_v53 = vadd.f32 %v2575_v51, %v2567_v35  ;;  %v1048_v63 = vmul.f32 %v2955_v11, %v1044_v1 }
 0x664   :  { %v1025_v55 = vpop.f32.mrf.mxu1 }
 0x665   :  { %v1045_v56 = vadd.f32 %v2336_v36, %v1034_v53  ;;  %v1026_v57 = vadd.f32 %v1025_v55, %v970_v54  ;;  %v1046_v14 = vmul.f32 %v2959_v19, %v1042_v52  ;;  %v1052_v5 = vmax.f32 %v1048_v63, 0.0 }
 0x666   :  { %v2590_v59 = vpop.f32.mrf.mxu1 }
 0x667   :  { %v1049_v61 = vmul.f32 %v2957_v17, %v1045_v56  ;;  %v1043_v16 = vadd.f32 %v2336_v36, %v1026_v57  ;;  %v1050_v2 = vmax.f32 %v1046_v14, 0.0 }
 0x668   :  { %v1157_v22 = vpop.f32.mrf.mxu1 }
 0x669   :  { %v1047_v62 = vmul.f32 %v2962_v24, %v1043_v16  ;;  %v1053_v0 = vmax.f32 %v1049_v61, 0.0  ;;  %v1268_v16 = vpop.trf.xlu0 }
 0x66a   :  { %v2591_v23 = vpop.f32.mrf.mxu1 }
 0x66b   :  { %v1051_v4 = vmax.f32 %v1047_v62, 0.0  ;;  %v1065_v7 = vpack.c.bf16 %v1053_v0, %v1052_v5 }
 0x66c   :  { %v1160_v25 = vpop.f32.mrf.mxu1 }
 0x66d   :  { %v1064_v6 = vpack.c.bf16 %v1051_v4, %v1050_v2 }
 0x66f   :  { %2580 = vmatprep.mubr.msk.bf16.mxu0 %vm448_vm8, %v1064_v6 }
 0x670   :  { %2581 = vmatmul.mubr.msk.bf16.vlgmr.msra.gmra.mxu0 %vm448_vm8, %v1065_v7  ;;  %v2785_v7 = vld [vmem:[%s3179_s2 + $0x8] sm:$0xff]   ;;  %s2851_s2 = smov [#allocation7]  }
 0x671   :  { %2594 = vmatprep.mubr.msk.bf16.mxu0 %vm2849_vm1, %v2848_v13  ;;  %s2288_s14 = sshll.u32 %s2851_s2, 4  ;;  %s2289_s14 = int_to_ptr.vmem [resolvable:$true] %s2288_s14 }
 0x672   :  { %s2818_s15 = scalar_lea.vmem %s2289_s14, 32  ;;  %p2823_p11 = scmp.lt.s32.totalorder %s2289_s14, %s2289_s14 }
 0x673   :  { %p2819_p10 = scmp.ne.s32.totalorder %s2289_s14, %s2818_s15  ;;  %p2824_p12 = scmp.lt.s32.totalorder %s2818_s15, %s2818_s15 }
 0x675   :  { %p2825_p13 = por %p2824_p12, %p2823_p11 }
 0x677   :  { %p2826_p0 = pnand %p2825_p13, %p2819_p10 }
 0x68d   :  { %v1238_v8 = vpop.xlane.xlu1 %1237 }
 0x68e   :  { %2773 = vrcp.f32 %v1238_v8 }
 0x691   :  { %v1241_v9 = vpop.xlane.xlu1 %1240 }
 0x692   :  { %2775 = vrcp.f32 %v1241_v9 }
 0x69b   :  { %v2774_v10 = vpop.eup %2773 }
 0x69c   :  { %v1247_v12 = vmul.f32 %v2774_v10, %v2770_v43 }
 0x69e   :  { %v1256_v18 = vmul.f32 %v2955_v11, %v1247_v12 }
 0x69f   :  { %v2776_v15 = vpop.eup %2775 }
 0x6a0   :  { %v1249_v60 = vmul.f32 %v2776_v15, %v2772_v3 }
 0x6a2   :  { %v1257_v20 = vmul.f32 %v2957_v17, %v1249_v60 }
 0x6a4   :  { %v3063_v21 = vpack.c.bf16 %v1257_v20, %v1256_v18 }
 0x6a6   :  { %1411 = vxpose.xlu1.c.b16.start.end [1/1] (short) (narrow) %v3063_v21, 16 }
 0x6c4   :  { %v1361_v26 = vpop.f32.mrf.mxu1 }
 0x6c6   :  { %v2602_v27 = vpop.f32.mrf.mxu1 }
 0x6c8   :  { %v1364_v28 = vpop.f32.mrf.mxu1 }
 0x6c9   :  { %v1368_v29 = vpack.c.bf16 %v1364_v28, %v1361_v26 }
 0x6ca   :  { %v2603_v30 = vpop.f32.mrf.mxu1 }
 0x708   :  { %v1419_v57 = vpop.trf.xlu1 }
 0x730   :  { %v2582_v31 = vpop.f32.mrf.mxu0 }
 0x731   :  { %v1166_v33 = vadd.f32 %v2590_v59, %v2582_v31 }
 0x732   :  { %v1108_v34 = vpop.f32.mrf.mxu0 }
 0x733   :  { %v1179_v37 = vadd.f32 %v2341_v32, %v1166_v33  ;;  %v1158_v38 = vadd.f32 %v1157_v22, %v1108_v34 }
 0x734   :  { %v2583_v39 = vpop.f32.mrf.mxu0 }
 0x735   :  { %v1177_v40 = vadd.f32 %v2341_v32, %v1158_v38  ;;  %v1169_v41 = vadd.f32 %v2591_v23, %v2583_v39  ;;  %v1183_v43 = vmax.f32 %v1179_v37, 0.0 }
 0x736   :  { %v1111_v42 = vpop.f32.mrf.mxu0 }
 0x737   :  { %v1180_v58 = vadd.f32 %v2341_v32, %v1169_v41  ;;  %v1161_v3 = vadd.f32 %v1160_v25, %v1111_v42  ;;  %v1181_v44 = vmax.f32 %v1177_v40, 0.0  ;;  %v1194_v47 = vsel %vm448_vm8, %v1183_v43, 0.0  ;;  %v1687_v41 = vld [vmem:[#allocation4 + $0x168] sm:$0xff]  ;;  %v1688_v42 = vld [vmem:[#allocation4 + $0x170] sm:$0xff] }
 0x738   :  { %v1252_v35 = vmul.f32 %v2955_v11, %v1183_v43 }
 0x739   :  { %v1184_v45 = vmax.f32 %v1180_v58, 0.0  ;;  %v1178_v46 = vadd.f32 %v2341_v32, %v1161_v3  ;;  %v1185_v51 = vsel %vm448_vm8, %v1181_v44, 0.0  ;;  %v1250_v53 = vmul.f32 %v2959_v19, %v1181_v44 }
 0x73a   :  { %v1690_v3 = vpack.c.bf16 %v1688_v42, %v1687_v41  ;;  %v1877_v41 = vld [vmem:[#allocation4 + $0x188] sm:$0xff] }
 0x73b   :  { %v1195_v48 = vsel %vm448_vm8, %v1184_v45, 0.0  ;;  %v1253_v49 = vmul.f32 %v2957_v17, %v1184_v45  ;;  %v1182_v50 = vmax.f32 %v1178_v46, 0.0  ;;  %v1685_v45 = vld [vmem:[#allocation4 + $0x158] sm:$0xff]  ;;  %v1686_v46 = vld [vmem:[#allocation4 + $0x160] sm:$0xff] }
 0x73c   :  { %v1196_v36 = vadd.f32 %v1195_v48, %v1194_v47  ;;  %v1689_v47 = vpack.c.bf16 %v1686_v46, %v1685_v45  ;;  %v1984_v45 = vld [vmem:[#allocation4 + $0x1e0] sm:$0xff] }
 0x73d   :  { %v1410_v52 = vpack.c.bf16 %v1253_v49, %v1252_v35  ;;  %v1186_v1 = vsel %vm448_vm8, %v1182_v50, 0.0  ;;  %v1251_v55 = vmul.f32 %v2962_v24, %v1182_v50 }
 0x73e   :  { %v1197_v54 = vrot.slane %v1196_v36, 4  ;;  %v1187_v56 = vadd.f32 %v1186_v1, %v1185_v51 }
 0x73f   :  { %2611 = vmatpush3.bf16.msra.mxu1 %v1410_v52  ;;  %v1259_v14 = vpack.c.bf16 %v1251_v55, %v1250_v53 }
 0x740   :  { %v1198_v11 = vadd.f32 %v1197_v54, %v1196_v36  ;;  %2622 = vmatprep.subr.bf16.mxu1 %v2848_v13  ;;  %v1188_v17 = vrot.slane %v1187_v56, 4 }
 0x741   :  { %2593 = vmatpush3.bf16.msra.mxu0 %v1259_v14  ;;  %v1680_v14 = vld [vmem:[#allocation4 + $0x148] sm:$0xff] }
 0x742   :  { %v1199_v61 = vrot.slane %v1198_v11, 2  ;;  %2613 = vmatmul.mubr.msk.bf16.vlgmr.msra.gmra.mxu1 %vm72_vm0, %v1419_v57  ;;  %v1189_v63 = vadd.f32 %v1188_v17, %v1187_v56  ;;  %2604 = vmatprep.subr.bf16.mxu0 %v2848_v13  ;;  %v1681_v17 = vld [vmem:[#allocation4 + $0x150] sm:$0xff] }
 0x743   :  { %2624 = vmatprep.mubr.msk.bf16.mxu1 %vm2849_vm1, %v2848_v13 }
 0x744   :  { %v1200_v19 = vadd.f32 %v1199_v61, %v1198_v11  ;;  %v1190_v24 = vrot.slane %v1189_v63, 2  ;;  %2595 = vmatmul.mubr.msk.bf16.vlgmr.msra.gmra.mxu0 %vm72_vm0, %v1268_v16 }
 0x745   :  { %2605 = vmatpush3.bf16.msra.mxu0 %v1368_v29  ;;  %2606 = vmatprep.mubr.msk.bf16.mxu0 %vm2849_vm1, %v2848_v13 }
 0x746   :  { %v1201_v62 = vrot.slane %v1200_v19, 1  ;;  %v1191_v0 = vadd.f32 %v1190_v24, %v1189_v63  ;;  %2616 = vmatprep.subr.bf16.mxu0 %v2848_v13 }
 0x748   :  { %v1192_v2 = vrot.slane %v1191_v0, 1  ;;  %v1202_v4 = vadd.f32 %v1201_v62, %v1200_v19  ;;  %v1684_v19 = vpack.c.bf16 %v1681_v17, %v1680_v14  ;;  %v1678_v62 = vld [vmem:[#allocation4 + $0x138] sm:$0xff]  ;;  %v1988_v17 = vld [vmem:[#allocation4 + $0x200] sm:$0xff] }
 0x749   :  { %v1987_v14 = vld [vmem:[#allocation4 + $0x1f8] sm:$0xff] }
 0x74a   :  { %v1193_v5 = vadd.f32 %v1192_v2, %v1191_v0  ;;  %v1679_v0 = vld [vmem:[#allocation4 + $0x140] sm:$0xff] }
 0x74b   :  { %v1683_v2 = vpack.c.bf16 %v1679_v0, %v1678_v62  ;;  %v2359_v62 = vld [vmem:[#allocation4 + $0x1c0] ss:$0 sm:$0xff] }
 0x74c   :  { %2607 = vmatmul.mubr.msk.bf16.vlgmr.msra.gmra.mxu0 %vm72_vm0, %v1268_v16  ;;  %v3085_v6 = vsel %vm1203_vm11, %v1193_v5, %v1202_v4 }
 0x74d   :  { %2617 = vmatpush3.bf16.msra.mxu0 %v3063_v21  ;;  %2618 = vmatprep.mubr.msk.bf16.mxu0 %vm2849_vm1, %v2848_v13 }
 0x74e   :  { %2628 = vmatprep.subr.bf16.mxu0 %v2848_v13 }
 0x754   :  { %2619 = vmatmul.mubr.msk.bf16.vlgmr.msra.gmra.mxu0 %vm72_vm0, %v2785_v7 }
 0x755   :  { %2630 = vmatprep.mubr.msk.bf16.mxu0 %vm2849_vm1, %v2848_v13 }
 0x802   :  { %v1464_v8 = vpop.f32.mrf.mxu1 }
 0x803   :  { %v1561_v9 = vrot.slane %v1464_v8, 4 }
 0x804   :  { %v2614_v10 = vpop.f32.mrf.mxu1  ;;  %v1313_v12 = vpop.f32.mrf.mxu0 }
 0x805   :  { %v1563_v15 = vsel %vm202_vm2, %v1313_v12, %v1561_v9 }
 0x806   :  { %v1467_v60 = vpop.f32.mrf.mxu1  ;;  %v1579_v18 = vpack.c.bf16 %v1563_v15, %v1563_v15  ;;  %v2596_v20 = vpop.f32.mrf.mxu0 }
 0x807   :  { %v2354_v60 = vld [vmem:[#allocation4 + $0x178] ss:$0 sm:$0xff] }
 0x808   :  { %v2615_v21 = vpop.f32.mrf.mxu1  ;;  %v1316_v59 = vpop.f32.mrf.mxu0  ;;  %v1584_v22 = vsel %vm593_vm9, %v1579_v18, 0  ;;  %v1627_v37 = vrot.slane %v1579_v18, 2 }
 0x809   :  { %2629 = vmatpush3.bf16.msra.mxu0 %v1584_v22 }
 0x80a   :  { %v2597_v23 = vpop.f32.mrf.mxu0  ;;  %2640 = vmatprep.subr.bf16.mxu0 %v2848_v13  ;;  %v1632_v38 = vsel %vm593_vm9, %v1627_v37, 0  ;;  %v1878_v37 = vld [vmem:[#allocation4 + $0x190] sm:$0xff] }
 0x80c   :  { %v1403_v25 = vpop.f32.mrf.mxu0 }
 0x80d   :  { %v1565_v26 = vsel %vm1564_vm12, %v1403_v25, 0.0 }
 0x80e   :  { %v2608_v27 = vpop.f32.mrf.mxu0  ;;  %1566 = vadd.xlane.f32.xlu1 %v1565_v26  ;;  %v1885_v26 = vld [vmem:[#allocation4 + $0x1b0] sm:$0xff] }
 0x80f   :  { %v1886_v27 = vld [vmem:[#allocation4 + $0x1b8] sm:$0xff] }
 0x810   :  { %v1406_v28 = vpop.f32.mrf.mxu0 }
 0x812   :  { %v2609_v29 = vpop.f32.mrf.mxu0 }
 0x814   :  { %v1512_v30 = vpop.f32.mrf.mxu0 }
 0x816   :  { %v2620_v31 = vpop.f32.mrf.mxu0 }
 0x818   :  { %v1515_v32 = vpop.f32.mrf.mxu0 }
 0x819   :  { %v1519_v33 = vpack.c.bf16 %v1515_v32, %v1512_v30  ;;  %v1888_v30 = vpack.c.bf16 %v1886_v27, %v1885_v26  ;;  %v1883_v32 = vld [vmem:[#allocation4 + $0x1a0] sm:$0xff] }
 0x81a   :  { %v2621_v34 = vpop.f32.mrf.mxu0  ;;  %v2110_v27 = vld [vmem:[#allocation4 + $0x240] sm:$0xff] }
 0x81b   :  { %2623 = vmatpush3.bf16.msra.mxu1 %v1519_v33  ;;  %v1884_v33 = vld [vmem:[#allocation4 + $0x1a8] sm:$0xff] }
 0x81c   :  { %2634 = vmatprep.subr.bf16.mxu1 %v2848_v13  ;;  %v1887_v34 = vpack.c.bf16 %v1884_v33, %v1883_v32  ;;  %v2362_v33 = vld [vmem:[#allocation4 + $0x208] ss:$0 sm:$0xff] }
 0x81e   :  { %2625 = vmatmul.mubr.msk.bf16.vlgmr.msra.gmra.mxu1 %vm72_vm0, %v1419_v57 }
 0x81f   :  { %2635 = vmatpush3.bf16.msra.mxu1 %v1632_v38  ;;  %2636 = vmatprep.mubr.msk.bf16.mxu1 %vm2849_vm1, %v2848_v13  ;;  %v1879_v38 = vld [vmem:[#allocation4 + $0x198] sm:$0xff] }
 0x820   :  { %2648 = vmatprep.subr.bf16.mxu1 %v2848_v13 }
 0x897   :  { %v1567_v39 = vpop.xlane.xlu1 %1566 }
 0x898   :  { %v1568_v40 = vmax.f32 %v1567_v39, 1.0  ;;  %v1882_v39 = vpack.c.bf16 %v1879_v38, %v1878_v37 }
 0x89a   :  { %2777 = vrcp.f32 %v1568_v40  ;;  %v1876_v40 = vld [vmem:[#allocation4 + $0x180] sm:$0xff] }
 0x89b   :  { %v1881_v42 = vpack.c.bf16 %v1877_v41, %v1876_v40 }
 0x8a7   :  { %v2778_v43 = vpop.eup %2777 }
 0x8a8   :  { %v1570_v58 = vmul.f32 %v2778_v43, %v1403_v25 }
 0x8aa   :  { %v3107_v44 = vpack.c.bf16 %v1570_v58, %v1570_v58 }
 0x8ac   :  { %2631 = vmatmul.mubr.msk.bf16.vlgmr.msra.gmra.mxu0 %vm586_vm10, %v3107_v44 }
 0x8ad   :  { %2641 = vmatpush3.bf16.msra.mxu0 %v1690_v3  ;;  %2644 = vmatprep.mubr.msk.bf16.mxu0 %vm2849_vm1, %v2848_v13 }
 0x8ae   :  { %2642 = vmatprep.subr.bf16.mxu0 %v2848_v13 }
 0x8b1   :  { %2643 = vmatpush3.bf16.msra.mxu0 %v1689_v47 }
 0x8b2   :  { %2656 = vmatprep.subr.bf16.mxu0 %v2848_v13 }
 0x8b4   :  { %2645 = vmatmul.mubr.msk.bf16.vlgmr.msra.gmra.mxu0 %vm448_vm8, %v1579_v18 }
 0x8b5   :  { %2658 = vmatprep.mubr.msk.bf16.mxu0 %vm2849_vm1, %v2848_v13 }
 0x8de   :  { %v1554_v35 = vpop.f32.mrf.mxu1 }
 0x8df   :  { %v1572_v48 = vsel %vm1564_vm12, %v1554_v35, 0.0 }
 0x8e0   :  { %1573 = vadd.xlane.f32.xlu0 %v1572_v48  ;;  %v2626_v49 = vpop.f32.mrf.mxu1 }
 0x8e2   :  { %v1557_v36 = vpop.f32.mrf.mxu1 }
 0x8e4   :  { %v2627_v50 = vpop.f32.mrf.mxu1 }
 0x969   :  { %v1574_v51 = vpop.xlane.xlu0 %1573 }
 0x96a   :  { %v1575_v52 = vmax.f32 %v1574_v51, 1.0 }
 0x96c   :  { %2779 = vrcp.f32 %v1575_v52  ;;  %v1620_v53 = vpop.f32.mrf.mxu0  ;;  %v1981_v52 = vld [vmem:[#allocation4 + $0x1c8] sm:$0xff] }
 0x96e   :  { %v2632_v54 = vpop.f32.mrf.mxu0 }
 0x970   :  { %v1623_v1 = vpop.f32.mrf.mxu0 }
 0x972   :  { %v2633_v55 = vpop.f32.mrf.mxu0 }
 0x974   :  { %v1727_v56 = vpop.f32.mrf.mxu0 }
 0x976   :  { %v2646_v57 = vpop.f32.mrf.mxu0 }
 0x978   :  { %v1730_v11 = vpop.f32.mrf.mxu0 }
 0x979   :  { %v2780_v61 = vpop.eup %2779 }
 0x97a   :  { %v2647_v16 = vpop.f32.mrf.mxu0  ;;  %v1577_v63 = vmul.f32 %v2780_v61, %v1554_v35  ;;  %v1993_v61 = vpack.c.bf16 %v1988_v17, %v1987_v14  ;;  %v2214_v14 = vld [vmem:[#allocation4 + $0x268] sm:$0xff]  ;;  %v2215_v17 = vld [vmem:[#allocation4 + $0x270] sm:$0xff] }
 0x97b   :  { %v1985_v16 = vld [vmem:[#allocation4 + $0x1e8] sm:$0xff] }
 0x97c   :  { %v1578_v24 = vpack.c.bf16 %v1577_v63, %v1577_v63  ;;  %v1986_v63 = vld [vmem:[#allocation4 + $0x1f0] sm:$0xff] }
 0x97e   :  { %2637 = vmatmul.mubr.msk.bf16.vlgmr.msra.gmra.mxu1 %vm586_vm10, %v1578_v24 }
 0x97f   :  { %2649 = vmatpush3.bf16.msra.mxu1 %v1684_v19  ;;  %2652 = vmatprep.mubr.msk.bf16.mxu1 %vm2849_vm1, %v2848_v13  ;;  %v1992_v19 = vpack.c.bf16 %v1986_v63, %v1985_v16  ;;  %v2212_v16 = vld [vmem:[#allocation4 + $0x258] sm:$0xff]  ;;  %v2213_v63 = vld [vmem:[#allocation4 + $0x260] sm:$0xff] }
 0x980   :  { %2650 = vmatprep.subr.bf16.mxu1 %v2848_v13 }
 0x983   :  { %2651 = vmatpush3.bf16.msra.mxu1 %v1683_v2 }
 0x984   :  { %2662 = vmatprep.subr.bf16.mxu1 %v2848_v13 }
 0xa3e   :  { %v1668_v4 = vpop.f32.mrf.mxu1 }
 0xa3f   :  { %v1675_v5 = vrot.slane %v1668_v4, 4 }
 0xa40   :  { %v2638_v7 = vpop.f32.mrf.mxu1 }
 0xa41   :  { %v1677_v8 = vsel %vm202_vm2, %v1620_v53, %v1675_v5  ;;  %v1982_v53 = vld [vmem:[#allocation4 + $0x1d0] sm:$0xff]  ;;  %v2106_v5 = vld [vmem:[#allocation4 + $0x220] sm:$0xff]  ;;  %v2107_v7 = vld [vmem:[#allocation4 + $0x228] sm:$0xff] }
 0xa42   :  { %v1682_v9 = vpack.c.bf16 %v1677_v8, %v1677_v8  ;;  %v1671_v10 = vpop.f32.mrf.mxu1  ;;  %v1989_v55 = vpack.c.bf16 %v1982_v53, %v1981_v52 }
 0xa44   :  { %v2639_v12 = vpop.f32.mrf.mxu1  ;;  %2653 = vmatmul.mubr.msk.bf16.vlgmr.msra.gmra.mxu1 %vm448_vm8, %v1682_v9 }
 0xa45   :  { %2664 = vmatprep.mubr.msk.bf16.mxu1 %vm2849_vm1, %v2848_v13  ;;  %v2115_v12 = vpack.c.bf16 %v2107_v7, %v2106_v5 }
 0xb04   :  { %v1770_v15 = vpop.f32.mrf.mxu1 }
 0xb05   :  { %v1771_v18 = vadd.f32 %v1770_v15, %v1727_v56 }
 0xb06   :  { %v2654_v20 = vpop.f32.mrf.mxu1 }
 0xb07   :  { %v1781_v21 = vadd.f32 %v2354_v60, %v1771_v18  ;;  %v2104_v60 = vld [vmem:[#allocation4 + $0x210] sm:$0xff]  ;;  %v2105_v18 = vld [vmem:[#allocation4 + $0x218] sm:$0xff] }
 0xb08   :  { %v1773_v59 = vpop.f32.mrf.mxu1 }
 0xb09   :  { %v1782_v22 = vmax.f32 %v1781_v21, 0.0  ;;  %v2114_v59 = vpack.c.bf16 %v2105_v18, %v2104_v60 }
 0xb0a   :  { %v2655_v23 = vpop.f32.mrf.mxu1 }
 0xb0b   :  { %v1783_v25 = vpack.c.bf16 %v1782_v22, %v1782_v22  ;;  %v1205_v22 = vmul.f32 0.0625, %v3085_v6 }
 0xb0d   :  { %v1785_v28 = vsel %vm593_vm9, %v1783_v25, 0  ;;  %v1828_v29 = vrot.slane %v1783_v25, 2  ;;  %v2113_v26 = vpack.c.bf16 %v1205_v22, %v1205_v22 }
 0xb0e   :  { %2657 = vmatpush3.bf16.msra.mxu0 %v1785_v28  ;;  %v2111_v28 = vld [vmem:[#allocation4 + $0x248] sm:$0xff] }
 0xb0f   :  { %v1830_v31 = vsel %vm593_vm9, %v1828_v29, 0  ;;  %2668 = vmatprep.subr.bf16.mxu0 %v2848_v13  ;;  %v2166_v29 = vpack.c.bf16 %v2111_v28, %v2110_v27 }
 0xb10   :  { %2663 = vmatpush3.bf16.msra.mxu1 %v1830_v31  ;;  %v2109_v31 = vld [vmem:[#allocation4 + $0x238] sm:$0xff] }
 0xb11   :  { %2659 = vmatmul.mubr.msk.bf16.vlgmr.msra.gmra.mxu0 %vm586_vm10, %v3107_v44  ;;  %2676 = vmatprep.subr.bf16.mxu1 %v2848_v13  ;;  %v1983_v44 = vld [vmem:[#allocation4 + $0x1d8] sm:$0xff] }
 0xb12   :  { %2669 = vmatpush3.bf16.msra.mxu0 %v1888_v30  ;;  %2672 = vmatprep.mubr.msk.bf16.mxu0 %vm2849_vm1, %v2848_v13  ;;  %v1990_v49 = vpack.c.bf16 %v1984_v45, %v1983_v44  ;;  %v2108_v30 = vld [vmem:[#allocation4 + $0x230] sm:$0xff] }
 0xb13   :  { %2665 = vmatmul.mubr.msk.bf16.vlgmr.msra.gmra.mxu1 %vm586_vm10, %v1578_v24  ;;  %2670 = vmatprep.subr.bf16.mxu0 %v2848_v13  ;;  %v2165_v32 = vpack.c.bf16 %v2109_v31, %v2108_v30 }
 0xb14   :  { %2680 = vmatprep.mubr.msk.bf16.mxu1 %vm2849_vm1, %v2848_v13  ;;  %2677 = vmatpush3.bf16.msra.mxu1 %v1882_v39 }
 0xb15   :  { %2678 = vmatprep.subr.bf16.mxu1 %v2848_v13 }
 0xb16   :  { %2671 = vmatpush3.bf16.msra.mxu0 %v1887_v34 }
 0xb17   :  { %2684 = vmatprep.subr.bf16.mxu0 %v2848_v13 }
 0xb18   :  { %2679 = vmatpush3.bf16.msra.mxu1 %v1881_v42 }
 0xb19   :  { %2673 = vmatmul.mubr.msk.bf16.vlgmr.msra.gmra.mxu0 %vm448_vm8, %v1783_v25  ;;  %2692 = vmatprep.subr.bf16.mxu1 %v2848_v13 }
 0xb1a   :  { %2688 = vmatprep.mubr.msk.bf16.mxu0 %vm2849_vm1, %v2848_v13  ;;  %2685 = vmatpush3.bf16.msra.mxu0 %v1993_v61  ;;  %v2218_v61 = vpack.c.bf16 %v2215_v17, %v2214_v14 }
 0xb1b   :  { %2686 = vmatprep.subr.bf16.mxu0 %v2848_v13 }
 0xb1e   :  { %2687 = vmatpush3.bf16.msra.mxu0 %v1992_v19  ;;  %v2217_v19 = vpack.c.bf16 %v2213_v63, %v2212_v16 }
 0xb1f   :  { %2700 = vmatprep.subr.bf16.mxu0 %v2848_v13 }
 0xbd1   :  { %v1821_v43 = vpop.f32.mrf.mxu0 }
 0xbd3   :  { %v2660_v58 = vpop.f32.mrf.mxu0  ;;  %v1866_v3 = vpop.f32.mrf.mxu1 }
 0xbd4   :  { %v1873_v46 = vrot.slane %v1866_v3, 4 }
 0xbd5   :  { %v1824_v47 = vpop.f32.mrf.mxu0  ;;  %v2666_v35 = vpop.f32.mrf.mxu1 }
 0xbd6   :  { %v1875_v48 = vsel %vm202_vm2, %v1821_v43, %v1873_v46 }
 0xbd7   :  { %v1880_v36 = vpack.c.bf16 %v1875_v48, %v1875_v48  ;;  %v2661_v50 = vpop.f32.mrf.mxu0  ;;  %v1869_v51 = vpop.f32.mrf.mxu1 }
 0xbd9   :  { %v2667_v54 = vpop.f32.mrf.mxu1  ;;  %v1925_v1 = vpop.f32.mrf.mxu0  ;;  %2681 = vmatmul.mubr.msk.bf16.vlgmr.msra.gmra.mxu1 %vm448_vm8, %v1880_v36 }
 0xbda   :  { %2693 = vmatpush3.bf16.msra.mxu1 %v1990_v49  ;;  %2696 = vmatprep.mubr.msk.bf16.mxu1 %vm2849_vm1, %v2848_v13 }
 0xbdb   :  { %v2674_v56 = vpop.f32.mrf.mxu0  ;;  %2694 = vmatprep.subr.bf16.mxu1 %v2848_v13 }
 0xbdd   :  { %v1928_v57 = vpop.f32.mrf.mxu0 }
 0xbde   :  { %2695 = vmatpush3.bf16.msra.mxu1 %v1989_v55 }
 0xbdf   :  { %v2675_v11 = vpop.f32.mrf.mxu0  ;;  %2708 = vmatprep.subr.bf16.mxu1 %v2848_v13 }
 0xbe1   :  { %2697 = vmatmul.mubr.msk.bf16.vlgmr.msra.gmra.mxu1 %vm448_vm8, %v1783_v25 }
 0xbe2   :  { %2712 = vmatprep.mubr.msk.bf16.mxu1 %vm2849_vm1, %v2848_v13  ;;  %2709 = vmatpush3.bf16.msra.mxu1 %v2166_v29 }
 0xbe3   :  { %2710 = vmatprep.subr.bf16.mxu1 %v2848_v13 }
 0xbe6   :  { %2711 = vmatpush3.bf16.msra.mxu1 %v2165_v32 }
 0xc99   :  { %v1968_v24 = vpop.f32.mrf.mxu1 }
 0xc9a   :  { %v1969_v0 = vadd.f32 %v1968_v24, %v1925_v1  ;;  %v2364_v24 = vld [vmem:[#allocation4 + $0x250] ss:$0 sm:$0xff] }
 0xc9b   :  { %v2682_v2 = vpop.f32.mrf.mxu1 }
 0xc9c   :  { %v1979_v4 = vadd.f32 %v2359_v62, %v1969_v0 }
 0xc9d   :  { %v1971_v8 = vpop.f32.mrf.mxu1 }
 0xc9e   :  { %v1980_v9 = vmax.f32 %v1979_v4, 0.0 }
 0xc9f   :  { %v2683_v10 = vpop.f32.mrf.mxu1 }
 0xca0   :  { %v1991_v15 = vpack.c.bf16 %v1980_v9, %v1980_v9  ;;  %v2366_v10 = vld [vmem:[#allocation4 + $0x278] ss:$0 sm:$0xff] }
 0xca1   :  { %v2071_v20 = vpop.f32.mrf.mxu1 }
 0xca2   :  { %2689 = vmatmul.mubr.msk.bf16.vlgmr.msra.gmra.mxu0 %vm448_vm8, %v1991_v15 }
 0xca3   :  { %v2698_v21 = vpop.f32.mrf.mxu1  ;;  %2701 = vmatpush3.bf16.msra.mxu0 %v2115_v12  ;;  %2704 = vmatprep.mubr.msk.bf16.mxu0 %vm2849_vm1, %v2848_v13 }
 0xca4   :  { %2702 = vmatprep.subr.bf16.mxu0 %v2848_v13 }
 0xca5   :  { %v2074_v23 = vpop.f32.mrf.mxu1 }
 0xca7   :  { %v2699_v25 = vpop.f32.mrf.mxu1  ;;  %2703 = vmatpush3.bf16.msra.mxu0 %v2114_v59 }
 0xca8   :  { %2716 = vmatprep.subr.bf16.mxu0 %v2848_v13 }
 0xcaa   :  { %2705 = vmatmul.mubr.msk.bf16.vlgmr.msra.gmra.mxu0 %vm448_vm8, %v2113_v26 }
 0xcab   :  { %2720 = vmatprep.mubr.msk.bf16.mxu0 %vm2849_vm1, %v2848_v13  ;;  %2717 = vmatpush3.bf16.msra.mxu0 %v2218_v61 }
 0xcac   :  { %2718 = vmatprep.subr.bf16.mxu0 %v2848_v13 }
 0xcaf   :  { %2719 = vmatpush3.bf16.msra.mxu0 %v2217_v19 }
 0xd62   :  { %v2031_v6 = vpop.f32.mrf.mxu0 }
 0xd63   :  { %v2072_v34 = vadd.f32 %v2071_v20, %v2031_v6 }
 0xd64   :  { %v2690_v37 = vpop.f32.mrf.mxu0 }
 0xd65   :  { %v2082_v38 = vadd.f32 %v2362_v33, %v2072_v34 }
 0xd66   :  { %v2034_v39 = vpop.f32.mrf.mxu0 }
 0xd67   :  { %v2083_v40 = vmax.f32 %v2082_v38, 0.0 }
 0xd68   :  { %v2691_v41 = vpop.f32.mrf.mxu0 }
 0xd69   :  { %v2085_v42 = vsel %vm2084_vm13, %v2083_v40, 0.0  ;;  %v2093_v43 = vrot.slane %v2083_v40, 4 }
 0xd6a   :  { %v2086_v58 = vrot.slane %v2085_v42, 4  ;;  %v2153_v3 = vpop.f32.mrf.mxu0 }
 0xd6b   :  { %v2095_v44 = vsel %vm2084_vm13, %v2093_v43, 0.0  ;;  %v2163_v62 = vadd.f32 %v2364_v24, %v2153_v3 }
 0xd6c   :  { %v2087_v45 = vadd.f32 %v2086_v58, %v2085_v42  ;;  %v2096_v46 = vrot.slane %v2095_v44, 4  ;;  %v2706_v47 = vpop.f32.mrf.mxu0 }
 0xd6e   :  { %v2088_v35 = vrot.slane %v2087_v45, 2  ;;  %v2097_v48 = vadd.f32 %v2096_v46, %v2095_v44  ;;  %v2156_v49 = vpop.f32.mrf.mxu0 }
 0xd70   :  { %v2089_v36 = vadd.f32 %v2088_v35, %v2087_v45  ;;  %v2098_v50 = vrot.slane %v2097_v48, 2  ;;  %v2707_v51 = vpop.f32.mrf.mxu0 }
 0xd72   :  { %v2090_v52 = vrot.slane %v2089_v36, 1  ;;  %v2099_v53 = vadd.f32 %v2098_v50, %v2097_v48 }
 0xd74   :  { %v2100_v54 = vrot.slane %v2099_v53, 1  ;;  %v2091_v1 = vadd.f32 %v2090_v52, %v2089_v36 }
 0xd76   :  { %v2101_v55 = vadd.f32 %v2100_v54, %v2099_v53 }
 0xd78   :  { %v2102_v56 = vsel %vm1203_vm11, %v2091_v1, %v2101_v55 }
 0xd79   :  { %v2103_v57 = vmul.f32 0.25, %v2102_v56 }
 0xd7b   :  { %v2164_v11 = vpack.c.bf16 %v2103_v57, %v2103_v57 }
 0xd7d   :  { %2713 = vmatmul.mubr.msk.bf16.vlgmr.msra.gmra.mxu1 %vm448_vm8, %v2164_v11 }
 0xe3d   :  { %v2204_v0 = vpop.f32.mrf.mxu1 }
 0xe3e   :  { %v2210_v2 = vadd.f32 %v2204_v0, %v2163_v62 }
 0xe3f   :  { %v2714_v4 = vpop.f32.mrf.mxu1 }
 0xe40   :  { %v2211_v5 = vmax.f32 %v2210_v2, 0.0 }
 0xe41   :  { %v2207_v7 = vpop.f32.mrf.mxu1 }
 0xe42   :  { %v2216_v8 = vpack.c.bf16 %v2211_v5, %v2211_v5 }
 0xe43   :  { %v2715_v9 = vpop.f32.mrf.mxu1 }
 0xe44   :  { %2721 = vmatmul.mubr.msk.bf16.vlgmr.msra.gmra.mxu0 %vm448_vm8, %v2216_v8 }
 0xf04   :  { %v2261_v12 = vpop.f32.mrf.mxu0 }
 0xf05   :  { %v2262_v15 = vadd.f32 %v2366_v10, %v2261_v12 }
 0xf06   :  { %v2722_v13 = vpop.f32.mrf.mxu0 }
 0xf07   :  { %v2268_v60 = vsel %vm2267_vm14, %v2262_v15, -inf }
 0xf08   :  { %2269 = vmax.xlane.f32.xlu0 %v2268_v60  ;;  %v2264_v18 = vpop.f32.mrf.mxu0 }
 0xf0a   :  { %v2723_v20 = vpop.f32.mrf.mxu0 }
 0xf91   :  { %v2270_v21 = vpop.xlane.xlu0 %2269 }
 0xf92   :  { %v2271_v59 = vsub.f32 %v2262_v15, %v2270_v21 }
 0xf94   :  { %v2272_v22 = vmul.f32 1.442695, %v2271_v59 }
 0xf96   :  { %2781 = vpow2.f32 %v2272_v22 }
 0xfa3   :  { %v2782_v23 = vpop.eup %2781 }
 0xfa4   :  { %v2274_v25 = vsel %vm2267_vm14, %v2782_v23, 0.0 }
 0xfa5   :  { %2275 = vadd.xlane.f32.xlu1 %v2274_v25 }
0x102e   :  { %v2276_v26 = vpop.xlane.xlu1 %2275 }
0x102f   :  { %2783 = vlog2.f32 %v2276_v26 }
0x103c   :  { %v2784_v27 = vpop.eup %2783 }
0x103d   :  { %v2278_v28 = vmul.f32 0.6931472, %v2784_v27 }
0x103f   :  { %v2279_v29 = vadd.f32 %v2278_v28, %v2270_v21 }
0x1041   :  { %v2280_v30 = vsub.f32 %v2262_v15, %v2279_v29 }
0x1043   :  { %2281 = vst.msk [vmem:[#allocation7] sm:$0x3] %vm2267_vm14, %v2280_v30 }
0x1044   :  { %2829 = shalt.err (!%p2826_p0)
}
0x1045   :  { %2291 = dma.vmem_to_hbm [thread:$0]  %s2289_s14, 32, %s3181_s4, [#allocation6]  }
0x1046   :  { %2842 = dma.done.wait [#allocation6], 32  }
0x1047   :  { %2843 = vsyncadd [#allocation6], 4294967264 }
0x1048   :  { %2295 = vsyncpa [#allocation5], 1 }
0x1049   :  { %2296 = vsyncpa [#allocation6], 1 }

</bundles_post_ra>
